<compile_context>
chip_gen: v7x
topology: tpu7x:2x2x1
jax: 0.10.0
libtpu: 0.0.40
codegen_flags: <defaults>
</compile_context>

<pallas_src>
import functools

import jax
import jax.numpy as jnp
from jax.experimental import pallas as pl
from jax.experimental.pallas import tpu as pltpu


def _round_up(x, m):
    return ((x + m - 1) // m) * m


# ----------------------------------------------------------------------------
# The single fused kernel.
#
# Activation layout for the convs: (C, N*HWpad) with lane index
# n*HWpad + h*W + w.  A valid conv output at local position p reads the input
# at p + (kh*W + kw); each (kh, kw) tap is a static lane shift (pltpu.roll).
# HWpad >= H*W + (k-1)*W + (k-1), so shifted reads of consumed positions never
# wrap and never cross into the next image.  Positions outside the valid conv
# window hold finite junk that is only ever multiplied by the zero rows of the
# expanded fc1 weights.
# ----------------------------------------------------------------------------
def _cnn_actor_kernel(x_ref, w1_ref, b1_ref, w2_ref, b2_ref,
                      fc1w_ref, fc1b_ref, fc2w_ref, fc2b_ref,
                      fc3w_ref, fc3b_ref, mean_ref,
                      *, k, img_w, img_hw, hwpad, n_batch):
    lanes = n_batch * hwpad

    # Fold the batch along lanes: (N, C0, HWpad) -> (C0, N*HWpad).
    x = jnp.concatenate([x_ref[n] for n in range(n_batch)], axis=1)

    def conv(v, w_ref, b_ref):
        # v: (Cin, N*HWpad) f32.  Stack the k*k shifted copies along the
        # contraction dim, cast ONCE, and run a single MXU matmul.
        taps = []
        for kh in range(k):
            for kw in range(k):
                s = kh * img_w + kw
                taps.append(v if s == 0 else pltpu.roll(v, lanes - s, axis=1))
        stacked = jnp.concatenate(taps, axis=0).astype(jnp.bfloat16)
        acc = jnp.dot(w_ref[...], stacked, preferred_element_type=jnp.float32)
        return jnp.maximum(acc + b_ref[...], 0.0)

    h = conv(x, w1_ref, b1_ref)            # (C1, N*HWpad) f32
    h = conv(h, w2_ref, b2_ref)            # (C2, N*HWpad) f32
    c2 = h.shape[0]

    # Assemble per-image channel-major flat features (N, C2*H*W).  No crop:
    # fc1 weights were expanded offline with zero rows for invalid positions.
    rows = []
    for n in range(n_batch):
        hn = h[:, n * hwpad: n * hwpad + img_hw]          # (C2, H*W), 128-aligned slice
        rows.append(jnp.concatenate(
            [hn[c:c + 1, :] for c in range(c2)], axis=1))  # (1, C2*H*W)
    feat = jnp.concatenate(rows, axis=0).astype(jnp.bfloat16)  # (N, C2*H*W) bf16

    z = jnp.dot(feat, fc1w_ref[...],
                preferred_element_type=jnp.float32) + fc1b_ref[...]
    z = jnp.maximum(z, 0.0)
    z = jnp.dot(z.astype(jnp.bfloat16), fc2w_ref[...],
                preferred_element_type=jnp.float32) + fc2b_ref[...]
    z = jnp.maximum(z, 0.0)
    logits = jnp.dot(z.astype(jnp.bfloat16), fc3w_ref[...],
                     preferred_element_type=jnp.float32) + fc3b_ref[...]

    m = jnp.max(logits, axis=-1, keepdims=True)
    e = jnp.exp(logits - m)
    mean_ref[...] = e * pl.reciprocal(jnp.sum(e, axis=-1, keepdims=True),
                                      approx=True)


# ----------------------------------------------------------------------------
# One-time weight packing (outside the per-call hot path).
# ----------------------------------------------------------------------------
def pack_params(params, state_shape):
    C0, H, W = state_shape
    conv1_w, conv2_w = params["conv1_w"], params["conv2_w"]
    C1, _, k, _ = conv1_w.shape
    C2 = conv2_w.shape[0]
    oh, ow = H - 2 * (k - 1), W - 2 * (k - 1)
    hw = H * W
    H1 = params["fc1_w"].shape[1]
    H2 = params["fc2_w"].shape[1]
    A = params["fc3_w"].shape[1]

    # Conv taps -> (Cout, k*k*Cin), column order (kh, kw, cin) to match the
    # stacked shifted activations built in the kernel.
    w1 = jnp.transpose(conv1_w, (0, 2, 3, 1)).reshape(C1, k * k * C0)
    w2 = jnp.transpose(conv2_w, (0, 2, 3, 1)).reshape(C2, k * k * C1)

    # fc1 expanded to the uncropped channel-major (C2*H*W, H1) layout with zero
    # rows for spatial positions outside the valid conv window.
    fc1_full = jnp.zeros((C2, H, W, H1), jnp.float32)
    fc1_full = fc1_full.at[:, :oh, :ow, :].set(
        params["fc1_w"].astype(jnp.float32).reshape(C2, oh, ow, H1))
    fc1w = fc1_full.reshape(C2 * hw, H1)

    return {
        "w1": w1.astype(jnp.bfloat16),
        "b1": params["conv1_b"].reshape(C1, 1).astype(jnp.float32),
        "w2": w2.astype(jnp.bfloat16),
        "b2": params["conv2_b"].reshape(C2, 1).astype(jnp.float32),
        "fc1w": fc1w.astype(jnp.bfloat16),
        "fc1b": params["fc1_b"].reshape(1, H1).astype(jnp.float32),
        "fc2w": params["fc2_w"].astype(jnp.bfloat16),
        "fc2b": params["fc2_b"].reshape(1, H2).astype(jnp.float32),
        "fc3w": params["fc3_w"].astype(jnp.bfloat16),
        "fc3b": params["fc3_b"].reshape(1, A).astype(jnp.float32),
        "log_std": params["log_std"].astype(jnp.float32),
    }


# ----------------------------------------------------------------------------
# CNNActor forward: (mean, log_std, std).
# ----------------------------------------------------------------------------
def cnn_actor_forward(x, packed):
    N, C0, H, W = x.shape
    kkc0 = packed["w1"].shape[1]
    k = int(round((kkc0 // C0) ** 0.5))
    C2 = packed["w2"].shape[0]
    A = packed["fc3b"].shape[1]
    hw = H * W
    assert packed["fc1w"].shape[0] == C2 * hw, "packed fc1 layout mismatch"
    hwpad = _round_up(hw + (k - 1) * W + (k - 1), 128)   # roll headroom + align

    # Flatten spatial dims, zero-pad lane tail per image.
    xf = jnp.pad(x.reshape(N, C0, hw).astype(jnp.float32),
                 ((0, 0), (0, 0), (0, hwpad - hw)))

    args = (xf, packed["w1"], packed["b1"], packed["w2"], packed["b2"],
            packed["fc1w"], packed["fc1b"], packed["fc2w"], packed["fc2b"],
            packed["fc3w"], packed["fc3b"])
    in_specs = [pl.BlockSpec(a.shape, lambda i, nd=a.ndim: (0,) * nd)
                for a in args]

    mean = pl.pallas_call(
        functools.partial(_cnn_actor_kernel, k=k, img_w=W, img_hw=hw,
                          hwpad=hwpad, n_batch=N),
        out_shape=jax.ShapeDtypeStruct((N, A), jnp.float32),
        grid=(1,),
        in_specs=in_specs,
        out_specs=pl.BlockSpec((N, A), lambda i: (0, 0)),
        compiler_params=pltpu.CompilerParams(
            dimension_semantics=("arbitrary",)),
    )(*args)

    log_std = jnp.broadcast_to(packed["log_std"], mean.shape)
    return mean, log_std, jnp.exp(log_std)


def init_params(key, in_ch, k, hc1, hc2, img, hidden1, hidden2, action_dim):
    keys = jax.random.split(key, 10)
    oh2 = img - 2 * (k - 1)
    flat = hc2 * oh2 * oh2
    s = 0.1
    return {
        "conv1_w": s * jax.random.normal(keys[0], (hc1, in_ch, k, k), jnp.float32),
        "conv1_b": s * jax.random.normal(keys[1], (hc1,), jnp.float32),
        "conv2_w": s * jax.random.normal(keys[2], (hc2, hc1, k, k), jnp.float32),
        "conv2_b": s * jax.random.normal(keys[3], (hc2,), jnp.float32),
        "fc1_w": s * jax.random.normal(keys[4], (flat, hidden1), jnp.float32),
        "fc1_b": s * jax.random.normal(keys[5], (hidden1,), jnp.float32),
        "fc2_w": s * jax.random.normal(keys[6], (hidden1, hidden2), jnp.float32),
        "fc2_b": s * jax.random.normal(keys[7], (hidden2,), jnp.float32),
        "fc3_w": s * jax.random.normal(keys[8], (hidden2, action_dim), jnp.float32),
        "fc3_b": s * jax.random.normal(keys[9], (action_dim,), jnp.float32),
        # nn.Parameter(torch.zeros(1, action_dim[0]))
        "log_std": jnp.zeros((1, action_dim), jnp.float32),
    }


# Pure-JAX reference with the same bf16 rounding points as the kernel.
def _reference_forward(x, params):
    bf = lambda a: a.astype(jnp.bfloat16).astype(jnp.float32)
    hp = jax.lax.Precision.HIGHEST

    def conv(v, w, b):
        y = jax.lax.conv_general_dilated(
            bf(v), bf(w), window_strides=(1, 1), padding="VALID",
            dimension_numbers=("NCHW", "OIHW", "NCHW"), precision=hp)
        return jax.nn.relu(y + b[None, :, None, None])

    h = conv(x, params["conv1_w"], params["conv1_b"])
    h = conv(h, params["conv2_w"], params["conv2_b"])
    h = h.reshape(x.shape[0], -1)
    h = jax.nn.relu(jnp.dot(bf(h), bf(params["fc1_w"]), precision=hp) + params["fc1_b"])
    h = jax.nn.relu(jnp.dot(bf(h), bf(params["fc2_w"]), precision=hp) + params["fc2_b"])
    logits = jnp.dot(bf(h), bf(params["fc3_w"]), precision=hp) + params["fc3_b"]
    mean = jax.nn.softmax(logits, axis=-1)
    log_std = jnp.broadcast_to(params["log_std"], mean.shape)
    return mean, log_std, jnp.exp(log_std)


if __name__ == "__main__":
    key = jax.random.PRNGKey(0)
    batch, in_ch, img = 2, 4, 16
    kernel_size, hc1, hc2 = 3, 2, 20
    hidden1, hidden2, action_dim = 64, 32, 6

    kx, kp = jax.random.split(key)
    x = jax.random.normal(kx, (batch, in_ch, img, img), jnp.float32)   # NCHW
    params = init_params(kp, in_ch, kernel_size, hc1, hc2, img,
                         hidden1, hidden2, action_dim)

    packed = pack_params(params, (in_ch, img, img))    # one-time weight packing
    fwd = jax.jit(cnn_actor_forward)
    mean, log_std, std = jax.block_until_ready(fwd(x, packed))

    assert mean.shape == (batch, action_dim)
    assert log_std.shape == (batch, action_dim)
    assert std.shape == (batch, action_dim)
    # softmax rows sum to ~1 (approx reciprocal in the kernel); std == exp(0) == 1
    assert bool(jnp.allclose(jnp.sum(mean, axis=-1), 1.0, atol=1e-2))
    assert bool(jnp.allclose(std, 1.0, atol=1e-6))

    # Cross-check against the pure-JAX reference (same bf16 rounding points).
    ref_mean, _, _ = _reference_forward(x, params)
    assert float(jnp.max(jnp.abs(mean - ref_mean))) < 2e-2

    print("KERNEL_OK")
</pallas_src>

<mosaic_0001>
module attributes {stable_mosaic.version = 11 : i64} {
  func.func @_cnn_actor_kernel(%arg0: i32, %arg1: memref<2x4x384xf32, #tpu.memory_space<vmem>>, %arg2: memref<2x36xbf16, #tpu.memory_space<vmem>>, %arg3: memref<2x1xf32, #tpu.memory_space<vmem>>, %arg4: memref<20x18xbf16, #tpu.memory_space<vmem>>, %arg5: memref<20x1xf32, #tpu.memory_space<vmem>>, %arg6: memref<5120x64xbf16, #tpu.memory_space<vmem>>, %arg7: memref<1x64xf32, #tpu.memory_space<vmem>>, %arg8: memref<64x32xbf16, #tpu.memory_space<vmem>>, %arg9: memref<1x32xf32, #tpu.memory_space<vmem>>, %arg10: memref<32x6xbf16, #tpu.memory_space<vmem>>, %arg11: memref<1x6xf32, #tpu.memory_space<vmem>>, %arg12: memref<2x6xf32, #tpu.memory_space<vmem>>) attributes {dimension_semantics = [#tpu.dimension_semantics<arbitrary>], iteration_bounds = array<i64: 1>, scalar_prefetch = 0 : i64, scratch_operands = 0 : i64, tpu.core_type = #tpu.core_type<tc>, window_params = [{pipeline_mode = #tpu.pipeline_mode<synchronous>, transform_indices = @transform_0, window_bounds = array<i64: 2, 4, 384>}, {pipeline_mode = #tpu.pipeline_mode<synchronous>, transform_indices = @transform_1, window_bounds = array<i64: 2, 36>}, {pipeline_mode = #tpu.pipeline_mode<synchronous>, transform_indices = @transform_2, window_bounds = array<i64: 2, 1>}, {pipeline_mode = #tpu.pipeline_mode<synchronous>, transform_indices = @transform_3, window_bounds = array<i64: 20, 18>}, {pipeline_mode = #tpu.pipeline_mode<synchronous>, transform_indices = @transform_4, window_bounds = array<i64: 20, 1>}, {pipeline_mode = #tpu.pipeline_mode<synchronous>, transform_indices = @transform_5, window_bounds = array<i64: 5120, 64>}, {pipeline_mode = #tpu.pipeline_mode<synchronous>, transform_indices = @transform_6, window_bounds = array<i64: 1, 64>}, {pipeline_mode = #tpu.pipeline_mode<synchronous>, transform_indices = @transform_7, window_bounds = array<i64: 64, 32>}, {pipeline_mode = #tpu.pipeline_mode<synchronous>, transform_indices = @transform_8, window_bounds = array<i64: 1, 32>}, {pipeline_mode = #tpu.pipeline_mode<synchronous>, transform_indices = @transform_9, window_bounds = array<i64: 32, 6>}, {pipeline_mode = #tpu.pipeline_mode<synchronous>, transform_indices = @transform_10, window_bounds = array<i64: 1, 6>}, {pipeline_mode = #tpu.pipeline_mode<synchronous>, transform_indices = @transform_11, window_bounds = array<i64: 2, 6>}]} {
    %c0 = arith.constant 0 : index
    %c0_0 = arith.constant 0 : index
    %c0_1 = arith.constant 0 : index
    %0 = vector.load %arg1[%c0, %c0_0, %c0_1] : memref<2x4x384xf32, #tpu.memory_space<vmem>>, vector<1x4x384xf32>
    %1 = vector.shape_cast %0 : vector<1x4x384xf32> to vector<4x384xf32>
    %c1 = arith.constant 1 : index
    %c0_2 = arith.constant 0 : index
    %c0_3 = arith.constant 0 : index
    %2 = vector.load %arg1[%c1, %c0_2, %c0_3] : memref<2x4x384xf32, #tpu.memory_space<vmem>>, vector<1x4x384xf32>
    %3 = vector.shape_cast %2 : vector<1x4x384xf32> to vector<4x384xf32>
    %4 = tpu.concatenate %1, %3 in 1 : vector<4x384xf32>, vector<4x384xf32> -> vector<4x768xf32>
    %c767_i32 = arith.constant 767 : i32
    %5 = tpu.dynamic_rotate %4 by %c767_i32 dim 1 : vector<4x768xf32>, i32 -> vector<4x768xf32>
    %c766_i32 = arith.constant 766 : i32
    %6 = tpu.dynamic_rotate %4 by %c766_i32 dim 1 : vector<4x768xf32>, i32 -> vector<4x768xf32>
    %c752_i32 = arith.constant 752 : i32
    %7 = tpu.dynamic_rotate %4 by %c752_i32 dim 1 : vector<4x768xf32>, i32 -> vector<4x768xf32>
    %c751_i32 = arith.constant 751 : i32
    %8 = tpu.dynamic_rotate %4 by %c751_i32 dim 1 : vector<4x768xf32>, i32 -> vector<4x768xf32>
    %c750_i32 = arith.constant 750 : i32
    %9 = tpu.dynamic_rotate %4 by %c750_i32 dim 1 : vector<4x768xf32>, i32 -> vector<4x768xf32>
    %c736_i32 = arith.constant 736 : i32
    %10 = tpu.dynamic_rotate %4 by %c736_i32 dim 1 : vector<4x768xf32>, i32 -> vector<4x768xf32>
    %c735_i32 = arith.constant 735 : i32
    %11 = tpu.dynamic_rotate %4 by %c735_i32 dim 1 : vector<4x768xf32>, i32 -> vector<4x768xf32>
    %c734_i32 = arith.constant 734 : i32
    %12 = tpu.dynamic_rotate %4 by %c734_i32 dim 1 : vector<4x768xf32>, i32 -> vector<4x768xf32>
    %13 = tpu.concatenate %4, %5, %6, %7, %8, %9, %10, %11, %12 in 0 : vector<4x768xf32>, vector<4x768xf32>, vector<4x768xf32>, vector<4x768xf32>, vector<4x768xf32>, vector<4x768xf32>, vector<4x768xf32>, vector<4x768xf32>, vector<4x768xf32> -> vector<36x768xf32>
    %14 = arith.truncf %13 : vector<36x768xf32> to vector<36x768xbf16>
    %c0_4 = arith.constant 0 : index
    %c0_5 = arith.constant 0 : index
    %15 = vector.load %arg2[%c0_4, %c0_5] : memref<2x36xbf16, #tpu.memory_space<vmem>>, vector<2x36xbf16>
    %cst = arith.constant dense<0.000000e+00> : vector<2x768xf32>
    %16 = tpu.matmul %15, %14, %cst {dimension_numbers = #tpu.dot_dimension_numbers<[1], [0], [0], [1], [0, 0, 1, 1], [], []>} : vector<2x36xbf16>, vector<36x768xbf16>, vector<2x768xf32> -> vector<2x768xf32>
    %c0_6 = arith.constant 0 : index
    %c0_7 = arith.constant 0 : index
    %17 = vector.load %arg3[%c0_6, %c0_7] : memref<2x1xf32, #tpu.memory_space<vmem>>, vector<2x1xf32>
    %18 = vector.broadcast %17 : vector<2x1xf32> to vector<2x768xf32>
    %19 = arith.addf %16, %18 : vector<2x768xf32>
    %cst_8 = arith.constant 0.000000e+00 : f32
    %20 = vector.broadcast %cst_8 : f32 to vector<2x768xf32>
    %21 = arith.maximumf %19, %20 : vector<2x768xf32>
    %c767_i32_9 = arith.constant 767 : i32
    %22 = tpu.dynamic_rotate %21 by %c767_i32_9 dim 1 : vector<2x768xf32>, i32 -> vector<2x768xf32>
    %c766_i32_10 = arith.constant 766 : i32
    %23 = tpu.dynamic_rotate %21 by %c766_i32_10 dim 1 : vector<2x768xf32>, i32 -> vector<2x768xf32>
    %c752_i32_11 = arith.constant 752 : i32
    %24 = tpu.dynamic_rotate %21 by %c752_i32_11 dim 1 : vector<2x768xf32>, i32 -> vector<2x768xf32>
    %c751_i32_12 = arith.constant 751 : i32
    %25 = tpu.dynamic_rotate %21 by %c751_i32_12 dim 1 : vector<2x768xf32>, i32 -> vector<2x768xf32>
    %c750_i32_13 = arith.constant 750 : i32
    %26 = tpu.dynamic_rotate %21 by %c750_i32_13 dim 1 : vector<2x768xf32>, i32 -> vector<2x768xf32>
    %c736_i32_14 = arith.constant 736 : i32
    %27 = tpu.dynamic_rotate %21 by %c736_i32_14 dim 1 : vector<2x768xf32>, i32 -> vector<2x768xf32>
    %c735_i32_15 = arith.constant 735 : i32
    %28 = tpu.dynamic_rotate %21 by %c735_i32_15 dim 1 : vector<2x768xf32>, i32 -> vector<2x768xf32>
    %c734_i32_16 = arith.constant 734 : i32
    %29 = tpu.dynamic_rotate %21 by %c734_i32_16 dim 1 : vector<2x768xf32>, i32 -> vector<2x768xf32>
    %30 = tpu.concatenate %21, %22, %23, %24, %25, %26, %27, %28, %29 in 0 : vector<2x768xf32>, vector<2x768xf32>, vector<2x768xf32>, vector<2x768xf32>, vector<2x768xf32>, vector<2x768xf32>, vector<2x768xf32>, vector<2x768xf32>, vector<2x768xf32> -> vector<18x768xf32>
    %31 = arith.truncf %30 : vector<18x768xf32> to vector<18x768xbf16>
    %c0_17 = arith.constant 0 : index
    %c0_18 = arith.constant 0 : index
    %32 = vector.load %arg4[%c0_17, %c0_18] : memref<20x18xbf16, #tpu.memory_space<vmem>>, vector<20x18xbf16>
    %cst_19 = arith.constant dense<0.000000e+00> : vector<20x768xf32>
    %33 = tpu.matmul %32, %31, %cst_19 {dimension_numbers = #tpu.dot_dimension_numbers<[1], [0], [0], [1], [0, 0, 1, 1], [], []>} : vector<20x18xbf16>, vector<18x768xbf16>, vector<20x768xf32> -> vector<20x768xf32>
    %c0_20 = arith.constant 0 : index
    %c0_21 = arith.constant 0 : index
    %34 = vector.load %arg5[%c0_20, %c0_21] : memref<20x1xf32, #tpu.memory_space<vmem>>, vector<20x1xf32>
    %35 = vector.broadcast %34 : vector<20x1xf32> to vector<20x768xf32>
    %36 = arith.addf %33, %35 : vector<20x768xf32>
    %cst_22 = arith.constant 0.000000e+00 : f32
    %37 = vector.broadcast %cst_22 : f32 to vector<20x768xf32>
    %38 = arith.maximumf %36, %37 : vector<20x768xf32>
    %39 = vector.extract_strided_slice %38 {offsets = [0, 0], sizes = [20, 256], strides = [1, 1]} : vector<20x768xf32> to vector<20x256xf32>
    %40 = vector.extract_strided_slice %39 {offsets = [0, 0], sizes = [1, 256], strides = [1, 1]} : vector<20x256xf32> to vector<1x256xf32>
    %41 = vector.extract_strided_slice %39 {offsets = [1, 0], sizes = [1, 256], strides = [1, 1]} : vector<20x256xf32> to vector<1x256xf32>
    %42 = vector.extract_strided_slice %39 {offsets = [2, 0], sizes = [1, 256], strides = [1, 1]} : vector<20x256xf32> to vector<1x256xf32>
    %43 = vector.extract_strided_slice %39 {offsets = [3, 0], sizes = [1, 256], strides = [1, 1]} : vector<20x256xf32> to vector<1x256xf32>
    %44 = vector.extract_strided_slice %39 {offsets = [4, 0], sizes = [1, 256], strides = [1, 1]} : vector<20x256xf32> to vector<1x256xf32>
    %45 = vector.extract_strided_slice %39 {offsets = [5, 0], sizes = [1, 256], strides = [1, 1]} : vector<20x256xf32> to vector<1x256xf32>
    %46 = vector.extract_strided_slice %39 {offsets = [6, 0], sizes = [1, 256], strides = [1, 1]} : vector<20x256xf32> to vector<1x256xf32>
    %47 = vector.extract_strided_slice %39 {offsets = [7, 0], sizes = [1, 256], strides = [1, 1]} : vector<20x256xf32> to vector<1x256xf32>
    %48 = vector.extract_strided_slice %39 {offsets = [8, 0], sizes = [1, 256], strides = [1, 1]} : vector<20x256xf32> to vector<1x256xf32>
    %49 = vector.extract_strided_slice %39 {offsets = [9, 0], sizes = [1, 256], strides = [1, 1]} : vector<20x256xf32> to vector<1x256xf32>
    %50 = vector.extract_strided_slice %39 {offsets = [10, 0], sizes = [1, 256], strides = [1, 1]} : vector<20x256xf32> to vector<1x256xf32>
    %51 = vector.extract_strided_slice %39 {offsets = [11, 0], sizes = [1, 256], strides = [1, 1]} : vector<20x256xf32> to vector<1x256xf32>
    %52 = vector.extract_strided_slice %39 {offsets = [12, 0], sizes = [1, 256], strides = [1, 1]} : vector<20x256xf32> to vector<1x256xf32>
    %53 = vector.extract_strided_slice %39 {offsets = [13, 0], sizes = [1, 256], strides = [1, 1]} : vector<20x256xf32> to vector<1x256xf32>
    %54 = vector.extract_strided_slice %39 {offsets = [14, 0], sizes = [1, 256], strides = [1, 1]} : vector<20x256xf32> to vector<1x256xf32>
    %55 = vector.extract_strided_slice %39 {offsets = [15, 0], sizes = [1, 256], strides = [1, 1]} : vector<20x256xf32> to vector<1x256xf32>
    %56 = vector.extract_strided_slice %39 {offsets = [16, 0], sizes = [1, 256], strides = [1, 1]} : vector<20x256xf32> to vector<1x256xf32>
    %57 = vector.extract_strided_slice %39 {offsets = [17, 0], sizes = [1, 256], strides = [1, 1]} : vector<20x256xf32> to vector<1x256xf32>
    %58 = vector.extract_strided_slice %39 {offsets = [18, 0], sizes = [1, 256], strides = [1, 1]} : vector<20x256xf32> to vector<1x256xf32>
    %59 = vector.extract_strided_slice %39 {offsets = [19, 0], sizes = [1, 256], strides = [1, 1]} : vector<20x256xf32> to vector<1x256xf32>
    %60 = tpu.concatenate %40, %41, %42, %43, %44, %45, %46, %47, %48, %49, %50, %51, %52, %53, %54, %55 in 1 : vector<1x256xf32>, vector<1x256xf32>, vector<1x256xf32>, vector<1x256xf32>, vector<1x256xf32>, vector<1x256xf32>, vector<1x256xf32>, vector<1x256xf32>, vector<1x256xf32>, vector<1x256xf32>, vector<1x256xf32>, vector<1x256xf32>, vector<1x256xf32>, vector<1x256xf32>, vector<1x256xf32>, vector<1x256xf32> -> vector<1x4096xf32>
    %61 = tpu.concatenate %56, %57, %58, %59 in 1 : vector<1x256xf32>, vector<1x256xf32>, vector<1x256xf32>, vector<1x256xf32> -> vector<1x1024xf32>
    %62 = tpu.concatenate %60, %61 in 1 : vector<1x4096xf32>, vector<1x1024xf32> -> vector<1x5120xf32>
    %63 = vector.extract_strided_slice %38 {offsets = [0, 384], sizes = [20, 256], strides = [1, 1]} : vector<20x768xf32> to vector<20x256xf32>
    %64 = vector.extract_strided_slice %63 {offsets = [0, 0], sizes = [1, 256], strides = [1, 1]} : vector<20x256xf32> to vector<1x256xf32>
    %65 = vector.extract_strided_slice %63 {offsets = [1, 0], sizes = [1, 256], strides = [1, 1]} : vector<20x256xf32> to vector<1x256xf32>
    %66 = vector.extract_strided_slice %63 {offsets = [2, 0], sizes = [1, 256], strides = [1, 1]} : vector<20x256xf32> to vector<1x256xf32>
    %67 = vector.extract_strided_slice %63 {offsets = [3, 0], sizes = [1, 256], strides = [1, 1]} : vector<20x256xf32> to vector<1x256xf32>
    %68 = vector.extract_strided_slice %63 {offsets = [4, 0], sizes = [1, 256], strides = [1, 1]} : vector<20x256xf32> to vector<1x256xf32>
    %69 = vector.extract_strided_slice %63 {offsets = [5, 0], sizes = [1, 256], strides = [1, 1]} : vector<20x256xf32> to vector<1x256xf32>
    %70 = vector.extract_strided_slice %63 {offsets = [6, 0], sizes = [1, 256], strides = [1, 1]} : vector<20x256xf32> to vector<1x256xf32>
    %71 = vector.extract_strided_slice %63 {offsets = [7, 0], sizes = [1, 256], strides = [1, 1]} : vector<20x256xf32> to vector<1x256xf32>
    %72 = vector.extract_strided_slice %63 {offsets = [8, 0], sizes = [1, 256], strides = [1, 1]} : vector<20x256xf32> to vector<1x256xf32>
    %73 = vector.extract_strided_slice %63 {offsets = [9, 0], sizes = [1, 256], strides = [1, 1]} : vector<20x256xf32> to vector<1x256xf32>
    %74 = vector.extract_strided_slice %63 {offsets = [10, 0], sizes = [1, 256], strides = [1, 1]} : vector<20x256xf32> to vector<1x256xf32>
    %75 = vector.extract_strided_slice %63 {offsets = [11, 0], sizes = [1, 256], strides = [1, 1]} : vector<20x256xf32> to vector<1x256xf32>
    %76 = vector.extract_strided_slice %63 {offsets = [12, 0], sizes = [1, 256], strides = [1, 1]} : vector<20x256xf32> to vector<1x256xf32>
    %77 = vector.extract_strided_slice %63 {offsets = [13, 0], sizes = [1, 256], strides = [1, 1]} : vector<20x256xf32> to vector<1x256xf32>
    %78 = vector.extract_strided_slice %63 {offsets = [14, 0], sizes = [1, 256], strides = [1, 1]} : vector<20x256xf32> to vector<1x256xf32>
    %79 = vector.extract_strided_slice %63 {offsets = [15, 0], sizes = [1, 256], strides = [1, 1]} : vector<20x256xf32> to vector<1x256xf32>
    %80 = vector.extract_strided_slice %63 {offsets = [16, 0], sizes = [1, 256], strides = [1, 1]} : vector<20x256xf32> to vector<1x256xf32>
    %81 = vector.extract_strided_slice %63 {offsets = [17, 0], sizes = [1, 256], strides = [1, 1]} : vector<20x256xf32> to vector<1x256xf32>
    %82 = vector.extract_strided_slice %63 {offsets = [18, 0], sizes = [1, 256], strides = [1, 1]} : vector<20x256xf32> to vector<1x256xf32>
    %83 = vector.extract_strided_slice %63 {offsets = [19, 0], sizes = [1, 256], strides = [1, 1]} : vector<20x256xf32> to vector<1x256xf32>
    %84 = tpu.concatenate %64, %65, %66, %67, %68, %69, %70, %71, %72, %73, %74, %75, %76, %77, %78, %79 in 1 : vector<1x256xf32>, vector<1x256xf32>, vector<1x256xf32>, vector<1x256xf32>, vector<1x256xf32>, vector<1x256xf32>, vector<1x256xf32>, vector<1x256xf32>, vector<1x256xf32>, vector<1x256xf32>, vector<1x256xf32>, vector<1x256xf32>, vector<1x256xf32>, vector<1x256xf32>, vector<1x256xf32>, vector<1x256xf32> -> vector<1x4096xf32>
    %85 = tpu.concatenate %80, %81, %82, %83 in 1 : vector<1x256xf32>, vector<1x256xf32>, vector<1x256xf32>, vector<1x256xf32> -> vector<1x1024xf32>
    %86 = tpu.concatenate %84, %85 in 1 : vector<1x4096xf32>, vector<1x1024xf32> -> vector<1x5120xf32>
    %87 = tpu.concatenate %62, %86 in 0 : vector<1x5120xf32>, vector<1x5120xf32> -> vector<2x5120xf32>
    %88 = arith.truncf %87 : vector<2x5120xf32> to vector<2x5120xbf16>
    %c0_23 = arith.constant 0 : index
    %c0_24 = arith.constant 0 : index
    %89 = vector.load %arg6[%c0_23, %c0_24] : memref<5120x64xbf16, #tpu.memory_space<vmem>>, vector<5120x64xbf16>
    %cst_25 = arith.constant dense<0.000000e+00> : vector<2x64xf32>
    %90 = tpu.matmul %88, %89, %cst_25 {dimension_numbers = #tpu.dot_dimension_numbers<[1], [0], [0], [1], [0, 0, 1, 1], [], []>} : vector<2x5120xbf16>, vector<5120x64xbf16>, vector<2x64xf32> -> vector<2x64xf32>
    %c0_26 = arith.constant 0 : index
    %c0_27 = arith.constant 0 : index
    %91 = vector.load %arg7[%c0_26, %c0_27] : memref<1x64xf32, #tpu.memory_space<vmem>>, vector<1x64xf32>
    %92 = vector.broadcast %91 : vector<1x64xf32> to vector<2x64xf32>
    %93 = arith.addf %90, %92 : vector<2x64xf32>
    %cst_28 = arith.constant 0.000000e+00 : f32
    %94 = vector.broadcast %cst_28 : f32 to vector<2x64xf32>
    %95 = arith.maximumf %93, %94 : vector<2x64xf32>
    %96 = arith.truncf %95 : vector<2x64xf32> to vector<2x64xbf16>
    %c0_29 = arith.constant 0 : index
    %c0_30 = arith.constant 0 : index
    %97 = vector.load %arg8[%c0_29, %c0_30] : memref<64x32xbf16, #tpu.memory_space<vmem>>, vector<64x32xbf16>
    %cst_31 = arith.constant dense<0.000000e+00> : vector<2x32xf32>
    %98 = tpu.matmul %96, %97, %cst_31 {dimension_numbers = #tpu.dot_dimension_numbers<[1], [0], [0], [1], [0, 0, 1, 1], [], []>} : vector<2x64xbf16>, vector<64x32xbf16>, vector<2x32xf32> -> vector<2x32xf32>
    %c0_32 = arith.constant 0 : index
    %c0_33 = arith.constant 0 : index
    %99 = vector.load %arg9[%c0_32, %c0_33] : memref<1x32xf32, #tpu.memory_space<vmem>>, vector<1x32xf32>
    %100 = vector.broadcast %99 : vector<1x32xf32> to vector<2x32xf32>
    %101 = arith.addf %98, %100 : vector<2x32xf32>
    %cst_34 = arith.constant 0.000000e+00 : f32
    %102 = vector.broadcast %cst_34 : f32 to vector<2x32xf32>
    %103 = arith.maximumf %101, %102 : vector<2x32xf32>
    %104 = arith.truncf %103 : vector<2x32xf32> to vector<2x32xbf16>
    %c0_35 = arith.constant 0 : index
    %c0_36 = arith.constant 0 : index
    %105 = vector.load %arg10[%c0_35, %c0_36] : memref<32x6xbf16, #tpu.memory_space<vmem>>, vector<32x6xbf16>
    %cst_37 = arith.constant dense<0.000000e+00> : vector<2x6xf32>
    %106 = tpu.matmul %104, %105, %cst_37 {dimension_numbers = #tpu.dot_dimension_numbers<[1], [0], [0], [1], [0, 0, 1, 1], [], []>} : vector<2x32xbf16>, vector<32x6xbf16>, vector<2x6xf32> -> vector<2x6xf32>
    %c0_38 = arith.constant 0 : index
    %c0_39 = arith.constant 0 : index
    %107 = vector.load %arg11[%c0_38, %c0_39] : memref<1x6xf32, #tpu.memory_space<vmem>>, vector<1x6xf32>
    %108 = vector.broadcast %107 : vector<1x6xf32> to vector<2x6xf32>
    %109 = arith.addf %106, %108 : vector<2x6xf32>
    %cst_40 = arith.constant dense<0xFF800000> : vector<2xf32>
    %110 = vector.multi_reduction <maximumf>, %109, %cst_40 [1] : vector<2x6xf32> to vector<2xf32>
    %111 = vector.shape_cast %110 : vector<2xf32> to vector<2x1xf32>
    %112 = vector.broadcast %111 : vector<2x1xf32> to vector<2x6xf32>
    %113 = arith.subf %109, %112 : vector<2x6xf32>
    %114 = math.exp %113 : vector<2x6xf32>
    %cst_41 = arith.constant dense<0.000000e+00> : vector<2xf32>
    %115 = vector.multi_reduction <add>, %114, %cst_41 [1] : vector<2x6xf32> to vector<2xf32>
    %116 = vector.shape_cast %115 : vector<2xf32> to vector<2x1xf32>
    %117 = tpu.reciprocal %116 {approx = true} : vector<2x1xf32> -> vector<2x1xf32>
    %118 = vector.broadcast %117 : vector<2x1xf32> to vector<2x6xf32>
    %119 = arith.mulf %114, %118 : vector<2x6xf32>
    %c0_42 = arith.constant 0 : index
    %c0_43 = arith.constant 0 : index
    %120 = vector.load %arg12[%c0_42, %c0_43] : memref<2x6xf32, #tpu.memory_space<vmem>>, vector<2x6xf32>
    tpu.vector_store %arg12[%c0_42, %c0_43], %119 {strides = array<i32>} : memref<2x6xf32, #tpu.memory_space<vmem>>, vector<2x6xf32>,
    return
  }
  func.func @transform_0(%arg0: i32) -> (i32, i32, i32) {
    %c0_i32 = arith.constant 0 : i32
    %c0_i32_0 = arith.constant 0 : i32
    %c0_i32_1 = arith.constant 0 : i32
    %c0_i32_2 = arith.constant 0 : i32
    return %c0_i32, %c0_i32_0, %c0_i32_1 : i32, i32, i32
  }
  func.func @transform_1(%arg0: i32) -> (i32, i32) {
    %c0_i32 = arith.constant 0 : i32
    %c0_i32_0 = arith.constant 0 : i32
    %c0_i32_1 = arith.constant 0 : i32
    return %c0_i32, %c0_i32_0 : i32, i32
  }
  func.func @transform_2(%arg0: i32) -> (i32, i32) {
    %c0_i32 = arith.constant 0 : i32
    %c0_i32_0 = arith.constant 0 : i32
    %c0_i32_1 = arith.constant 0 : i32
    return %c0_i32, %c0_i32_0 : i32, i32
  }
  func.func @transform_3(%arg0: i32) -> (i32, i32) {
    %c0_i32 = arith.constant 0 : i32
    %c0_i32_0 = arith.constant 0 : i32
    %c0_i32_1 = arith.constant 0 : i32
    return %c0_i32, %c0_i32_0 : i32, i32
  }
  func.func @transform_4(%arg0: i32) -> (i32, i32) {
    %c0_i32 = arith.constant 0 : i32
    %c0_i32_0 = arith.constant 0 : i32
    %c0_i32_1 = arith.constant 0 : i32
    return %c0_i32, %c0_i32_0 : i32, i32
  }
  func.func @transform_5(%arg0: i32) -> (i32, i32) {
    %c0_i32 = arith.constant 0 : i32
    %c0_i32_0 = arith.constant 0 : i32
    %c0_i32_1 = arith.constant 0 : i32
    return %c0_i32, %c0_i32_0 : i32, i32
  }
  func.func @transform_6(%arg0: i32) -> (i32, i32) {
    %c0_i32 = arith.constant 0 : i32
    %c0_i32_0 = arith.constant 0 : i32
    %c0_i32_1 = arith.constant 0 : i32
    return %c0_i32, %c0_i32_0 : i32, i32
  }
  func.func @transform_7(%arg0: i32) -> (i32, i32) {
    %c0_i32 = arith.constant 0 : i32
    %c0_i32_0 = arith.constant 0 : i32
    %c0_i32_1 = arith.constant 0 : i32
    return %c0_i32, %c0_i32_0 : i32, i32
  }
  func.func @transform_8(%arg0: i32) -> (i32, i32) {
    %c0_i32 = arith.constant 0 : i32
    %c0_i32_0 = arith.constant 0 : i32
    %c0_i32_1 = arith.constant 0 : i32
    return %c0_i32, %c0_i32_0 : i32, i32
  }
  func.func @transform_9(%arg0: i32) -> (i32, i32) {
    %c0_i32 = arith.constant 0 : i32
    %c0_i32_0 = arith.constant 0 : i32
    %c0_i32_1 = arith.constant 0 : i32
    return %c0_i32, %c0_i32_0 : i32, i32
  }
  func.func @transform_10(%arg0: i32) -> (i32, i32) {
    %c0_i32 = arith.constant 0 : i32
    %c0_i32_0 = arith.constant 0 : i32
    %c0_i32_1 = arith.constant 0 : i32
    return %c0_i32, %c0_i32_0 : i32, i32
  }
  func.func @transform_11(%arg0: i32) -> (i32, i32) {
    %c0_i32 = arith.constant 0 : i32
    %c0_i32_0 = arith.constant 0 : i32
    %c0_i32_1 = arith.constant 0 : i32
    return %c0_i32, %c0_i32_0 : i32, i32
  }
}

</mosaic_0001>

<bundles_post_ra>
// kernel: cnn_actor_forward.1
= control target key start
LH: loop header
LB: loop body
LE: loop exit
PB: predicated region body
PF: predicated region fallthrough
CT: control target
= control target key end

     0   :  { %s6220_s23 = smov 127   ;;  %s6221_s24 = smov 112   ;;  %v63_v8 = vlaneseq  ;;  %v6228_v12 = vmov 0   ;;  %vm277_vm3 = vcmask 1043456   ;;  %vm331_vm9 = vcmask 1041408   ;;  %s8287_s0 = inlined_call_operand.vmem [shape: f32[2,4,384], index: 0, kind: input, shape index: {}]   ;;  %s8288_s1 = inlined_call_operand.vmem [shape: bf16[2,36], index: 1, kind: input, shape index: {}]   ;;  %s8289_s2 = inlined_call_operand.vmem [shape: f32[2,1], index: 2, kind: input, shape index: {}]   ;;  %s8290_s3 = inlined_call_operand.vmem [shape: bf16[20,18], index: 3, kind: input, shape index: {}]   ;;  %s8291_s4 = inlined_call_operand.vmem [shape: f32[20,1], index: 4, kind: input, shape index: {}]   ;;  %s8292_s5 = inlined_call_operand.vmem [shape: bf16[5120,64], index: 5, kind: input, shape index: {}]   ;;  %s8293_s6 = inlined_call_operand.vmem [shape: f32[1,64], index: 6, kind: input, shape index: {}]   ;;  %s8294_s7 = inlined_call_operand.vmem [shape: bf16[64,32], index: 7, kind: input, shape index: {}]   ;;  %s8295_s8 = inlined_call_operand.vmem [shape: f32[1,32], index: 8, kind: input, shape index: {}]   ;;  %s8296_s9 = inlined_call_operand.vmem [shape: bf16[32,6], index: 9, kind: input, shape index: {}]   ;;  %s8297_s10 = inlined_call_operand.vmem [shape: f32[1,6], index: 10, kind: input, shape index: {}]   ;;  %s8298_s11 = inlined_call_operand.hbm [shape: f32[2,6], index: 11, kind: output, shape index: {}]  }
   0x1   :  { %v6295_v0 = vld [vmem:[%s8287_s0] sm:$0xff]  ;;  %v4812_v1 = vld [vmem:[%s8287_s0 + $0xc] sm:$0xff]  ;;  %v41_v2 = vld [vmem:[%s8287_s0 + $0x8] sm:$0xf]  ;;  %s6222_s25 = smov 126   ;;  %s6223_s26 = smov 110   ;;  %382 = vmatprep.mubr.bf16.mxu0 %v6228_v12  ;;  %423 = vmatprep.mubr.bf16.mxu1 %v6228_v12 }
   0x2   :  { %v5682_v3 = vpack.i.bf16 %v4812_v1, %v6295_v0  ;;  %v6306_v4 = vcombine.high %v6295_v0, %v6295_v0  ;;  %v6310_v6 = vcombine.high %v4812_v1, %v4812_v1  ;;  %s6224_s27 = smov 95   ;;  %s6225_s28 = smov 111   ;;  %v5747_v9 = vpack.i.bf16 %v4812_v1, %v41_v2  ;;  %v4813_v10 = vld [vmem:[%s8287_s0 + $0x14] sm:$0xf]  ;;  %5752 = vset.pattern.permute.xlu0 %v6228_v12  ;;  %v321_v13 = vld [vmem:[%s8289_s2] sm:$0x3] }
   0x3   :  { %s6226_s29 = smov 96   ;;  %s6227_s30 = smov 94   ;;  %v6345_v11 = vand.u32 127, %v63_v8  ;;  %5858 = vset.pattern.permute.xlu1 %v6228_v12  ;;  %vm327_vm10 = vcmask 293888  }
   0x4   :  { %5683 = vrot.lane.b32.xlu1 %v5682_v3, %s6220_s23  ;;  %v5672_v5 = vpack.i.bf16 %v41_v2, %v6306_v4  ;;  %v5742_v7 = vpack.i.bf16 %v6306_v4, %v6295_v0 }
   0x5   :  { %vm65_vm0 = vcmp.lt.s32.totalorder %v6345_v11, 127  ;;  %vm103_vm1 = vcmp.lt.s32.totalorder %v6345_v11, 112  ;;  %vm84_vm2 = vcmp.lt.s32.totalorder %v6345_v11, 126  ;;  %vm141_vm4 = vcmp.lt.s32.totalorder %v6345_v11, 110 }
   0x6   :  { %5673 = vrot.lane.b32.xlu0 %v5672_v5, %s6220_s23  ;;  %vm179_vm5 = vcmp.lt.s32.totalorder %v6345_v11, 95  ;;  %vm122_vm6 = vcmp.lt.s32.totalorder %v6345_v11, 111  ;;  %vm160_vm7 = vcmp.lt.s32.totalorder %v6345_v11, 96  ;;  %vm198_vm8 = vcmp.lt.s32.totalorder %v6345_v11, 94 }
   0x8   :  { %59 = vrot.lane.b32.xlu1 %v6310_v6, %s6220_s23 }
   0xa   :  { %5678 = vrot.lane.b32.xlu0 %v5672_v5, %s6221_s24 }
   0xc   :  { %99 = vrot.lane.b32.xlu1 %v6310_v6, %s6221_s24 }
   0xe   :  { %5688 = vrot.lane.b32.xlu0 %v5682_v3, %s6221_s24 }
  0x10   :  { %5698 = vrot.lane.b32.xlu1 %v5682_v3, %s6222_s25 }
  0x12   :  { %5693 = vrot.lane.b32.xlu0 %v5672_v5, %s6222_s25 }
  0x14   :  { %5703 = vrot.lane.b32.xlu1 %v5672_v5, %s6223_s26 }
  0x16   :  { %80 = vrot.lane.b32.xlu0 %v6310_v6, %s6222_s25 }
  0x18   :  { %5713 = vrot.lane.b32.xlu1 %v5682_v3, %s6223_s26 }
  0x1a   :  { %5708 = vrot.lane.b32.xlu0 %v5672_v5, %s6224_s27 }
  0x1c   :  { %5718 = vrot.lane.b32.xlu1 %v5682_v3, %s6224_s27 }
  0x1e   :  { %137 = vrot.lane.b32.xlu0 %v6310_v6, %s6223_s26 }
  0x20   :  { %5723 = vrot.lane.b32.xlu1 %v5672_v5, %s6225_s28 }
  0x22   :  { %175 = vrot.lane.b32.xlu0 %v6310_v6, %s6224_s27 }
  0x24   :  { %5733 = vrot.lane.b32.xlu1 %v5682_v3, %s6225_s28 }
  0x26   :  { %5728 = vrot.lane.b32.xlu0 %v5672_v5, %s6226_s29 }
  0x28   :  { %5738 = vrot.lane.b32.xlu1 %v5682_v3, %s6226_s29 }
  0x2a   :  { %118 = vrot.lane.b32.xlu0 %v6310_v6, %s6225_s28 }
  0x2c   :  { %5743 = vrot.lane.b32.xlu1 %v5742_v7, %s6227_s30 }
  0x2e   :  { %156 = vrot.lane.b32.xlu0 %v6310_v6, %s6226_s29 }
  0x30   :  { %194 = vrot.lane.b32.xlu1 %v6310_v6, %s6227_s30 }
  0x32   :  { %5748 = vrot.lane.b32.xlu0 %v5747_v9, %s6227_s30  ;;  %v6194_v9 = vld [vmem:[%s8287_s0 + $0x8] sm:$0xf] }
  0x34   :  { %101 = vrot.lane.b32.xlu1 %v4813_v10, %s6221_s24 }
  0x36   :  { %61 = vrot.lane.b32.xlu0 %v4813_v10, %s6220_s23 }
  0x38   :  { %139 = vrot.lane.b32.xlu1 %v4813_v10, %s6223_s26 }
  0x3a   :  { %82 = vrot.lane.b32.xlu0 %v4813_v10, %s6222_s25 }
  0x3c   :  { %120 = vrot.lane.b32.xlu1 %v4813_v10, %s6225_s28 }
  0x3e   :  { %177 = vrot.lane.b32.xlu0 %v4813_v10, %s6224_s27 }
  0x40   :  { %196 = vrot.lane.b32.xlu1 %v4813_v10, %s6227_s30 }
  0x42   :  { %158 = vrot.lane.b32.xlu0 %v4813_v10, %s6226_s29 }
  0x46   :  { %324 = vperm.xlu0 %5752, %v321_v13  }
  0x76   :  { %v6366_v14 = vpop.permute.xlu1 %5683 }
  0x77   :  { %v5686_v15 = vunpack.i.h.bf16 %v6366_v14  ;;  %v5685_v16 = vunpack.i.l.bf16 %v6366_v14 }
  0x78   :  { %v5674_v17 = vpop.permute.xlu0 %5673 }
  0x79   :  { %v5676_v18 = vunpack.i.h.bf16 %v5674_v17  ;;  %v5675_v19 = vunpack.i.l.bf16 %v5674_v17 }
  0x7a   :  { %v6370_v20 = vpop.permute.xlu1 %59 }
  0x7b   :  { %v68_v21 = vsel %vm65_vm0, %v5676_v18, %v5686_v15  ;;  %v70_v22 = vsel %vm65_vm0, %v5685_v16, %v5675_v19  ;;  %v67_v26 = vsel %vm65_vm0, %v5686_v15, %v6370_v20  ;;  %v69_v29 = vsel %vm65_vm0, %v5675_v19, %v5676_v18 }
  0x7c   :  { %v213_v23 = vrot.slane %v68_v21, 4  ;;  %v211_v24 = vrot.slane %v70_v22, 4  ;;  %v5679_v25 = vpop.permute.xlu0 %5678  ;;  %v214_v31 = vrot.slane %v67_v26, 4  ;;  %v212_v33 = vrot.slane %v69_v29, 4 }
  0x7d   :  { %v5681_v27 = vunpack.i.h.bf16 %v5679_v25  ;;  %v5680_v28 = vunpack.i.l.bf16 %v5679_v25 }
  0x7e   :  { %v6385_v30 = vpop.permute.xlu1 %99  ;;  %v279_v52 = vsel %vm277_vm3, %v6306_v4, %v212_v33  ;;  %v278_v54 = vsel %vm277_vm3, %v6295_v0, %v211_v24  ;;  %v6193_v0 = vld [vmem:[%s8287_s0 + $0xc] sm:$0xff]  ;;  %v280_v10 = vsel %vm277_vm3, %v6194_v9, %v213_v23 }
  0x7f   :  { %v107_v36 = vsel %vm103_vm1, %v5680_v28, %v5681_v27  ;;  %v281_v2 = vsel %vm277_vm3, %v6193_v0, %v214_v31 }
  0x80   :  { %v6387_v32 = vpop.permute.xlu0 %5688  ;;  %v230_v44 = vrot.slane %v107_v36, 4 }
  0x81   :  { %v5691_v34 = vunpack.i.h.bf16 %v6387_v32  ;;  %v5690_v35 = vunpack.i.l.bf16 %v6387_v32 }
  0x82   :  { %v6393_v37 = vpop.permute.xlu1 %5698 }
  0x83   :  { %v106_v38 = vsel %vm103_vm1, %v5681_v27, %v5691_v34  ;;  %v108_v39 = vsel %vm103_vm1, %v5690_v35, %v5680_v28  ;;  %v5700_v40 = vunpack.i.l.bf16 %v6393_v37  ;;  %v5701_v42 = vunpack.i.h.bf16 %v6393_v37 }
  0x84   :  { %v229_v41 = vrot.slane %v108_v39, 4  ;;  %v5694_v43 = vpop.permute.xlu0 %5693  ;;  %v105_v45 = vsel %vm103_vm1, %v5691_v34, %v6385_v30  ;;  %v231_v46 = vrot.slane %v106_v38, 4 }
  0x85   :  { %v5696_v47 = vunpack.i.h.bf16 %v5694_v43  ;;  %v5695_v48 = vunpack.i.l.bf16 %v5694_v43  ;;  %v232_v49 = vrot.slane %v105_v45, 4 }
  0x86   :  { %v5704_v50 = vpop.permute.xlu1 %5703 }
  0x87   :  { %v88_v51 = vsel %vm84_vm2, %v5695_v48, %v5696_v47  ;;  %v89_v53 = vsel %vm84_vm2, %v5700_v40, %v5695_v48  ;;  %v5706_v55 = vunpack.i.h.bf16 %v5704_v50  ;;  %v87_v59 = vsel %vm84_vm2, %v5696_v47, %v5701_v42 }
  0x88   :  { %v6417_v56 = vpop.permute.xlu0 %80  ;;  %v285_v57 = vsel %vm277_vm3, %v88_v51, %v230_v44  ;;  %v284_v58 = vsel %vm277_vm3, %v89_v53, %v229_v41  ;;  %v5705_v60 = vunpack.i.l.bf16 %v5704_v50  ;;  %v286_v4 = vsel %vm277_vm3, %v87_v59, %v231_v46 }
  0x89   :  { %v86_v61 = vsel %vm84_vm2, %v5701_v42, %v6417_v56  ;;  %v303_v62 = vpack.c.bf16 %v285_v57, %v279_v52  ;;  %v302_v63 = vpack.c.bf16 %v284_v58, %v278_v54  ;;  %v304_v15 = vpack.c.bf16 %v286_v4, %v280_v10 }
  0x8a   :  { %v6426_v1 = vpop.permute.xlu1 %5713  ;;  %v287_v3 = vsel %vm277_vm3, %v86_v61, %v232_v49  ;;  %v145_v17 = vsel %vm141_vm4, %v5705_v60, %v5706_v55 }
  0x8b   :  { %v5716_v5 = vunpack.i.h.bf16 %v6426_v1  ;;  %v5715_v7 = vunpack.i.l.bf16 %v6426_v1  ;;  %350 = vmatprep.subr.bf16.mxu0 %v303_v62  ;;  %v305_v8 = vpack.c.bf16 %v287_v3, %v281_v2  ;;  %v248_v27 = vrot.slane %v145_v17, 4 }
  0x8c   :  { %v5709_v13 = vpop.permute.xlu0 %5708  ;;  %351 = vmatpush1.bf16.msra.mxu0 %v302_v63 }
  0x8d   :  { %v146_v18 = vsel %vm141_vm4, %v5715_v7, %v5705_v60  ;;  %v5711_v19 = vunpack.i.h.bf16 %v5709_v13  ;;  %v5710_v21 = vunpack.i.l.bf16 %v5709_v13  ;;  %391 = vmatprep.subr.bf16.mxu1 %v305_v8  ;;  %v144_v23 = vsel %vm141_vm4, %v5706_v55, %v5716_v5 }
  0x8e   :  { %v6447_v22 = vpop.permute.xlu1 %5718  ;;  %392 = vmatpush1.bf16.msra.mxu1 %v304_v15  ;;  %v247_v28 = vrot.slane %v146_v18, 4  ;;  %v249_v34 = vrot.slane %v144_v23, 4 }
  0x8f   :  { %v183_v24 = vsel %vm179_vm5, %v5710_v21, %v5711_v19  ;;  %v5721_v25 = vunpack.i.h.bf16 %v6447_v22  ;;  %v5720_v26 = vunpack.i.l.bf16 %v6447_v22 }
  0x90   :  { %v6456_v29 = vpop.permute.xlu0 %137  ;;  %v266_v36 = vrot.slane %v183_v24, 4 }
  0x91   :  { %v182_v31 = vsel %vm179_vm5, %v5711_v19, %v5721_v25  ;;  %v184_v33 = vsel %vm179_vm5, %v5720_v26, %v5710_v21  ;;  %v143_v42 = vsel %vm141_vm4, %v5716_v5, %v6456_v29 }
  0x92   :  { %v265_v38 = vrot.slane %v184_v33, 4  ;;  %v267_v39 = vrot.slane %v182_v31, 4  ;;  %v5724_v41 = vpop.permute.xlu1 %5723  ;;  %v250_v47 = vrot.slane %v143_v42, 4 }
  0x93   :  { %v5726_v44 = vunpack.i.h.bf16 %v5724_v41  ;;  %v5725_v45 = vunpack.i.l.bf16 %v5724_v41 }
  0x94   :  { %v6468_v43 = vpop.permute.xlu0 %175 }
  0x95   :  { %v181_v46 = vsel %vm179_vm5, %v5721_v25, %v6468_v43  ;;  %v126_v52 = vsel %vm122_vm6, %v5725_v45, %v5726_v44 }
  0x96   :  { %v268_v48 = vrot.slane %v181_v46, 4  ;;  %v6473_v49 = vpop.permute.xlu1 %5733  ;;  %v291_v63 = vsel %vm277_vm3, %v126_v52, %v248_v27 }
  0x97   :  { %v5735_v50 = vunpack.i.l.bf16 %v6473_v49  ;;  %v5736_v61 = vunpack.i.h.bf16 %v6473_v49 }
  0x98   :  { %v5729_v51 = vpop.permute.xlu0 %5728 }
  0x99   :  { %v5731_v53 = vunpack.i.h.bf16 %v5729_v51  ;;  %v5730_v54 = vunpack.i.l.bf16 %v5729_v51  ;;  %v127_v57 = vsel %vm122_vm6, %v5735_v50, %v5725_v45  ;;  %v125_v18 = vsel %vm122_vm6, %v5726_v44, %v5736_v61 }
  0x9a   :  { %v6479_v55 = vpop.permute.xlu1 %5738  ;;  %v290_v8 = vsel %vm277_vm3, %v127_v57, %v247_v28  ;;  %v292_v33 = vsel %vm277_vm3, %v125_v18, %v249_v34 }
  0x9b   :  { %v164_v58 = vsel %vm160_vm7, %v5730_v54, %v5731_v53  ;;  %v5741_v59 = vunpack.i.h.bf16 %v6479_v55  ;;  %v5740_v60 = vunpack.i.l.bf16 %v6479_v55 }
  0x9c   :  { %v6490_v62 = vpop.permute.xlu0 %118  ;;  %v297_v0 = vsel %vm277_vm3, %v164_v58, %v266_v36 }
  0x9d   :  { %v165_v2 = vsel %vm160_vm7, %v5740_v60, %v5730_v54  ;;  %v309_v3 = vpack.c.bf16 %v297_v0, %v291_v63  ;;  %v163_v4 = vsel %vm160_vm7, %v5731_v53, %v5741_v59  ;;  %v124_v10 = vsel %vm122_vm6, %v5736_v61, %v6490_v62 }
  0x9e   :  { %v6500_v5 = vpop.permute.xlu1 %5743  ;;  %v296_v9 = vsel %vm277_vm3, %v165_v2, %v265_v38  ;;  %v298_v23 = vsel %vm277_vm3, %v163_v4, %v267_v39  ;;  %v293_v25 = vsel %vm277_vm3, %v124_v10, %v250_v47 }
  0x9f   :  { %v5746_v13 = vunpack.i.h.bf16 %v6500_v5  ;;  %v5745_v15 = vunpack.i.l.bf16 %v6500_v5  ;;  %352 = vmatprep.subr.bf16.mxu0 %v309_v3  ;;  %v308_v17 = vpack.c.bf16 %v296_v9, %v290_v8  ;;  %v310_v38 = vpack.c.bf16 %v298_v23, %v292_v33 }
  0xa0   :  { %v6511_v19 = vpop.permute.xlu0 %156 }
  0xa1   :  { %v162_v21 = vsel %vm160_vm7, %v5741_v59, %v6511_v19  ;;  %353 = vmatpush1.bf16.msra.mxu0 %v308_v17  ;;  %v203_v24 = vsel %vm198_vm8, %v5745_v15, %v5746_v13  ;;  %v320_v59 = vld [vmem:[%s8288_s1] sm:$0x1] }
  0xa2   :  { %v299_v27 = vsel %vm277_vm3, %v162_v21, %v268_v48  ;;  %v6523_v28 = vpop.permute.xlu1 %194  ;;  %v314_v41 = vpack.c.bf16 %v203_v24, %v203_v24 }
  0xa3   :  { %v311_v31 = vpack.c.bf16 %v299_v27, %v293_v25 }
  0xa4   :  { %v5749_v36 = vpop.permute.xlu0 %5748  ;;  %v333_v53 = vsel %vm331_vm9, %v314_v41, 0 }
  0xa5   :  { %v5751_v39 = vunpack.i.h.bf16 %v5749_v36  ;;  %v5750_v42 = vunpack.i.l.bf16 %v5749_v36  ;;  %393 = vmatprep.subr.bf16.mxu1 %v311_v31 }
  0xa6   :  { %v102_v44 = vpop.permute.xlu1 %101  ;;  %394 = vmatpush1.bf16.msra.mxu1 %v310_v38 }
  0xa7   :  { %v200_v45 = vsel %vm198_vm8, %v5751_v39, %v6523_v28  ;;  %v202_v46 = vsel %vm198_vm8, %v5746_v13, %v5750_v42  ;;  %v104_v34 = vsel %vm103_vm1, %v6385_v30, %v102_v44  ;;  %v109_v54 = vsel %vm103_vm1, %v102_v44, %v5690_v35  ;;  %v6195_v13 = vld [vmem:[%s8287_s0 + $0x14] sm:$0xf] }
  0xa8   :  { %v317_v47 = vpack.c.bf16 %v200_v45, %v200_v45  ;;  %v315_v48 = vpack.c.bf16 %v202_v46, %v202_v46  ;;  %v233_v51 = vrot.slane %v104_v34, 4  ;;  %v62_v52 = vpop.permute.xlu0 %61  ;;  %v201_v58 = vsel %vm198_vm8, %v5750_v42, %v5751_v39 }
  0xa9   :  { %v66_v57 = vsel %vm65_vm0, %v6370_v20, %v62_v52  ;;  %v71_v30 = vsel %vm65_vm0, %v62_v52, %v5685_v16  ;;  %v316_v20 = vpack.c.bf16 %v201_v58, %v201_v58  ;;  %v234_v35 = vrot.slane %v109_v54, 4 }
  0xaa   :  { %v215_v32 = vrot.slane %v66_v57, 4  ;;  %v216_v61 = vrot.slane %v71_v30, 4  ;;  %v140_v63 = vpop.permute.xlu1 %139  ;;  %4814 = vmatprep.subr.msk.bf16.mxu0 %vm331_vm9, %v315_v48  ;;  %4816 = vmatprep.subr.msk.bf16.mxu1 %vm331_vm9, %v317_v47 }
  0xab   :  { %v142_v14 = vsel %vm141_vm4, %v6456_v29, %v140_v63  ;;  %v147_v16 = vsel %vm141_vm4, %v140_v63, %v5715_v7  ;;  %355 = vmatpush1.bf16.msra.mxu0 %v333_v53  ;;  %v339_v3 = vsel %vm331_vm9, %v316_v20, 0 }
  0xac   :  { %v251_v0 = vrot.slane %v142_v14, 4  ;;  %v252_v2 = vrot.slane %v147_v16, 4  ;;  %v83_v4 = vpop.permute.xlu0 %82  ;;  %396 = vmatpush1.bf16.msra.mxu1 %v339_v3  ;;  %v282_v7 = vsel %vm277_vm3, %v6310_v6, %v215_v32 }
  0xad   :  { %v85_v8 = vsel %vm84_vm2, %v6417_v56, %v83_v4  ;;  %v90_v1 = vsel %vm84_vm2, %v83_v4, %v5700_v40  ;;  %v283_v56 = vsel %vm277_vm3, %v6195_v13, %v216_v61 }
  0xae   :  { %v288_v29 = vsel %vm277_vm3, %v85_v8, %v233_v51  ;;  %v289_v9 = vsel %vm277_vm3, %v90_v1, %v234_v35  ;;  %v121_v10 = vpop.permute.xlu1 %120  ;;  %4815 = vmatmul.mubr.msk.bf16.vlgmr.msra.gmra.mrb[0].mxu0 %vm327_vm10, %v320_v59 }
  0xaf   :  { %v306_v37 = vpack.c.bf16 %v288_v29, %v282_v7  ;;  %v307_v17 = vpack.c.bf16 %v289_v9, %v283_v56  ;;  %464 = vmatprep.mubr.bf16.mxu0 %v6228_v12  ;;  %4817 = vmatmul.mubr.msk.bf16.vlgmr.msra.gmra.mrb[0].mxu1 %vm327_vm10, %v320_v59  ;;  %v123_v21 = vsel %vm122_vm6, %v6490_v62, %v121_v10 }
  0xb0   :  { %v178_v6 = vpop.permute.xlu0 %177  ;;  %867 = vmatprep.mubr.bf16.mxu1 %v6228_v12  ;;  %v128_v23 = vsel %vm122_vm6, %v121_v10, %v5735_v50  ;;  %v294_v31 = vsel %vm277_vm3, %v123_v21, %v251_v0 }
  0xb1   :  { %v180_v40 = vsel %vm179_vm5, %v6468_v43, %v178_v6  ;;  %v185_v18 = vsel %vm179_vm5, %v178_v6, %v5720_v26  ;;  %432 = vmatprep.subr.bf16.mxu0 %v307_v17  ;;  %v295_v33 = vsel %vm277_vm3, %v128_v23, %v252_v2 }
  0xb2   :  { %v269_v24 = vrot.slane %v180_v40, 4  ;;  %v270_v25 = vrot.slane %v185_v18, 4  ;;  %v197_v43 = vpop.permute.xlu1 %196  ;;  %433 = vmatpush1.bf16.msra.mxu0 %v306_v37 }
  0xb3   :  { %v199_v22 = vsel %vm198_vm8, %v6523_v28, %v197_v43  ;;  %v204_v62 = vsel %vm198_vm8, %v197_v43, %v5745_v15 }
  0xb4   :  { %v318_v26 = vpack.c.bf16 %v199_v22, %v199_v22  ;;  %v159_v27 = vpop.permute.xlu0 %158  ;;  %v319_v42 = vpack.c.bf16 %v204_v62, %v204_v62 }
  0xb5   :  { %v161_v49 = vsel %vm160_vm7, %v6511_v19, %v159_v27  ;;  %v166_v50 = vsel %vm160_vm7, %v159_v27, %v5740_v60 }
  0xb6   :  { %v300_v28 = vsel %vm277_vm3, %v161_v49, %v269_v24  ;;  %v301_v36 = vsel %vm277_vm3, %v166_v50, %v270_v25  ;;  %v345_v38 = vsel %vm331_vm9, %v318_v26, 0 }
  0xb7   :  { %v312_v41 = vpack.c.bf16 %v300_v28, %v294_v31  ;;  %v313_v39 = vpack.c.bf16 %v301_v36, %v295_v33 }
  0xb9   :  { %434 = vmatprep.subr.bf16.mxu0 %v313_v39 }
  0xba   :  { %435 = vmatpush1.bf16.msra.mxu0 %v312_v41 }
  0xbb   :  { %4818 = vmatprep.subr.msk.bf16.mxu0 %vm331_vm9, %v319_v42 }
  0xbe   :  { %437 = vmatpush1.bf16.msra.mxu0 %v345_v38 }
  0xc1   :  { %4819 = vmatmul.mubr.msk.bf16.vlgmr.msra.gmra.mrb[4].mxu0 %vm327_vm10, %v320_v59 }
  0xc2   :  { %918 = vmatprep.mubr.bf16.mxu0 %v6228_v12 }
  0xc3   :  { %16 = vsyncpa [#allocation3], 0  ;;  %v784_v8 = vld [vmem:[%s8291_s4 + $0x8] sm:$0xff]  ;;  %v783_v1 = vld [vmem:[%s8291_s4] sm:$0xff]  ;;  %vm743_vm11 = vcmask 1045504   ;;  %vm816_vm12 = vcmask 1040384  }
  0xc4   :  { %v785_v7 = vld [vmem:[%s8291_s4 + $0x10] sm:$0xf]  ;;  %vm809_vm13 = vcmask 146432   ;;  %vm6230_vm14 = vmmov 0   ;;  %vm4672_vm15 = vcmask 523264  }
  0xc5   :  { %v325_v55 = vpop.permute.xlu0 %324 }
 0x181   :  { %v384_v60 = vpop.f32.mrb[0].mxu0 }
 0x182   :  { %v385_v5 = vadd.f32 %v384_v60, %v325_v55  ;;  %v386_v15 = vpop.f32.mrb[1].mxu0  ;;  %v425_v19 = vpop.f32.mrb[0].mxu1 }
 0x183   :  { %v388_v44 = vpop.f32.mrb[2].mxu0  ;;  %v426_v46 = vadd.f32 %v425_v19, %v325_v55  ;;  %v387_v34 = vadd.f32 %v386_v15, %v325_v55  ;;  %v427_v47 = vpop.f32.mrb[1].mxu1 }
 0x184   :  { %v6616_v45 = vmax.f32 %v385_v5, 0.0  ;;  %v389_v48 = vpop.f32.mrb[3].mxu0  ;;  %v428_v51 = vadd.f32 %v427_v47, %v325_v55  ;;  %v429_v52 = vpop.f32.mrb[2].mxu1 }
 0x185   :  { %v430_v53 = vpop.f32.mrb[3].mxu1  ;;  %v6624_v57 = vmax.f32 %v426_v46, 0.0  ;;  %v6626_v30 = vmax.f32 %v387_v34, 0.0 }
 0x186   :  { %587 = vrot.lane.b32.xlu1 %v6616_v45, %s6224_s27  ;;  %533 = vrot.lane.b32.xlu0 %v6616_v45, %s6225_s28  ;;  %v6622_v54 = vmax.f32 %v428_v51, 0.0 }
 0x187   :  { %v5753_v59 = vpack.i.bf16 %v6624_v57, %v6626_v30  ;;  %v5813_v2 = vpack.i.bf16 %v6626_v30, %v6616_v45 }
 0x188   :  { %v5763_v58 = vpack.i.bf16 %v6622_v54, %v6616_v45 }
 0x18a   :  { %609 = vrot.lane.b32.xlu1 %v6624_v57, %s6227_s30  ;;  %5764 = vrot.lane.b32.xlu0 %v5763_v58, %s6220_s23 }
 0x18e   :  { %5754 = vrot.lane.b32.xlu1 %v5753_v59, %s6220_s23  ;;  %5774 = vrot.lane.b32.xlu0 %v5763_v58, %s6223_s26 }
 0x192   :  { %5759 = vrot.lane.b32.xlu1 %v5753_v59, %s6223_s26  ;;  %5784 = vrot.lane.b32.xlu0 %v5763_v58, %s6222_s25 }
 0x194   :  { %v466_v32 = vpop.f32.mrb[4].mxu0 }
 0x195   :  { %v468_v61 = vpop.f32.mrb[5].mxu0  ;;  %v467_v14 = vadd.f32 %v466_v32, %v325_v55 }
 0x196   :  { %5769 = vrot.lane.b32.xlu1 %v5753_v59, %s6222_s25  ;;  %v470_v63 = vpop.f32.mrb[6].mxu0  ;;  %5794 = vrot.lane.b32.xlu0 %v5753_v59, %s6225_s28  ;;  %v469_v16 = vadd.f32 %v468_v61, %v325_v55 }
 0x197   :  { %v471_v20 = vpop.f32.mrb[7].mxu0  ;;  %v6643_v35 = vmax.f32 %v467_v14, 0.0 }
 0x198   :  { %v6645_v0 = vmax.f32 %v469_v16, 0.0 }
 0x199   :  { %v5818_v4 = vpack.i.bf16 %v6643_v35, %v6622_v54 }
 0x19a   :  { %5779 = vrot.lane.b32.xlu1 %v5753_v59, %s6226_s29  ;;  %5804 = vrot.lane.b32.xlu0 %v5753_v59, %s6224_s27  ;;  %v5823_v3 = vpack.i.bf16 %v6645_v0, %v6643_v35 }
 0x19e   :  { %5789 = vrot.lane.b32.xlu1 %v5753_v59, %s6221_s24  ;;  %5814 = vrot.lane.b32.xlu0 %v5813_v2, %s6227_s30 }
 0x1a2   :  { %5799 = vrot.lane.b32.xlu1 %v5763_v58, %s6226_s29  ;;  %5824 = vrot.lane.b32.xlu0 %v5823_v3, %s6220_s23 }
 0x1a6   :  { %5809 = vrot.lane.b32.xlu1 %v5763_v58, %s6221_s24  ;;  %5834 = vrot.lane.b32.xlu0 %v5823_v3, %s6222_s25 }
 0x1aa   :  { %5819 = vrot.lane.b32.xlu1 %v5818_v4, %s6225_s28  ;;  %5849 = vrot.lane.b32.xlu0 %v5823_v3, %s6221_s24 }
 0x1ae   :  { %5829 = vrot.lane.b32.xlu1 %v5823_v3, %s6223_s26  ;;  %543 = vrot.lane.b32.xlu0 %v6645_v0, %s6225_s28 }
 0x1b2   :  { %5839 = vrot.lane.b32.xlu1 %v5823_v3, %s6226_s29  ;;  %597 = vrot.lane.b32.xlu0 %v6645_v0, %s6224_s27 }
 0x1b6   :  { %5844 = vrot.lane.b32.xlu1 %v5818_v4, %s6224_s27  ;;  %615 = vrot.lane.b32.xlu0 %v6645_v0, %s6227_s30 }
 0x1ba   :  { %5854 = vrot.lane.b32.xlu1 %v5818_v4, %s6227_s30  ;;  %793 = vperm.xlu0 %5752, %v784_v8  }
 0x1be   :  { %788 = vperm.xlu1 %5858, %v783_v1  }
 0x1c2   :  { %798 = vperm.xlu1 %5858, %v785_v7  }
 0x1f8   :  { %v6680_v29 = vpop.permute.xlu1 %587  ;;  %v6682_v9 = vpop.permute.xlu0 %533 }
 0x1fc   :  { %v6684_v10 = vpop.permute.xlu1 %609  ;;  %v6686_v13 = vpop.permute.xlu0 %5764 }
 0x1fd   :  { %v5767_v40 = vunpack.i.h.bf16 %v6686_v13  ;;  %v5766_v18 = vunpack.i.l.bf16 %v6686_v13 }
 0x200   :  { %v5755_v56 = vpop.permute.xlu1 %5754  ;;  %v6688_v6 = vpop.permute.xlu0 %5774 }
 0x201   :  { %v5757_v37 = vunpack.i.h.bf16 %v5755_v56  ;;  %v5756_v17 = vunpack.i.l.bf16 %v5755_v56  ;;  %v5776_v50 = vunpack.i.l.bf16 %v6688_v6  ;;  %v5777_v38 = vunpack.i.h.bf16 %v6688_v6 }
 0x203   :  { %v493_v21 = vsel %vm65_vm0, %v5757_v37, %v5767_v40  ;;  %v495_v23 = vsel %vm65_vm0, %v5766_v18, %v5756_v17  ;;  %v494_v43 = vsel %vm65_vm0, %v5756_v17, %v5757_v37 }
 0x204   :  { %v5760_v24 = vpop.permute.xlu1 %5759  ;;  %v6700_v25 = vpop.permute.xlu0 %5784  ;;  %v629_v22 = vrot.slane %v495_v23, 6  ;;  %v631_v26 = vrot.slane %v493_v21, 6  ;;  %v630_v49 = vrot.slane %v494_v43, 6 }
 0x205   :  { %v5761_v27 = vunpack.i.l.bf16 %v5760_v24  ;;  %v5762_v31 = vunpack.i.h.bf16 %v5760_v24  ;;  %v5786_v41 = vunpack.i.l.bf16 %v6700_v25  ;;  %v5787_v15 = vunpack.i.h.bf16 %v6700_v25 }
 0x206   :  { %v731_v55 = vsel %vm331_vm9, %v6616_v45, %v629_v22  ;;  %v733_v60 = vsel %vm331_vm9, %v6624_v57, %v631_v26  ;;  %v732_v53 = vsel %vm331_vm9, %v6626_v30, %v630_v49 }
 0x207   :  { %v567_v5 = vsel %vm141_vm4, %v5776_v50, %v5761_v27  ;;  %v6724_v19 = vsel %vm141_vm4, %v5762_v31, %v5777_v38  ;;  %v566_v44 = vsel %vm141_vm4, %v5761_v27, %v5762_v31 }
 0x208   :  { %v5770_v33 = vpop.permute.xlu1 %5769  ;;  %v6705_v36 = vpop.permute.xlu0 %5794  ;;  %v683_v57 = vrot.slane %v567_v5, 6  ;;  %v684_v61 = vrot.slane %v566_v44, 6  ;;  %v685_v17 = vrot.slane %v6724_v19, 6 }
 0x209   :  { %v5772_v62 = vunpack.i.h.bf16 %v5770_v33  ;;  %v5771_v28 = vunpack.i.l.bf16 %v5770_v33  ;;  %v5797_v39 = vunpack.i.h.bf16 %v6705_v36  ;;  %v5796_v42 = vunpack.i.l.bf16 %v6705_v36 }
 0x20b   :  { %v512_v45 = vsel %vm84_vm2, %v5771_v28, %v5772_v62  ;;  %v513_v46 = vsel %vm84_vm2, %v5786_v41, %v5771_v28  ;;  %v511_v47 = vsel %vm84_vm2, %v5772_v62, %v5787_v15  ;;  %v548_v58 = vsel %vm122_vm6, %v5796_v42, %v5797_v39 }
 0x20c   :  { %v5780_v34 = vpop.permute.xlu1 %5779  ;;  %v6738_v52 = vpop.permute.xlu0 %5804  ;;  %v647_v63 = vrot.slane %v513_v46, 4  ;;  %v648_v20 = vrot.slane %v512_v45, 4  ;;  %v649_v16 = vrot.slane %v511_v47, 4  ;;  %v549_v30 = vsel %vm122_vm6, %v6682_v9, %v5796_v42 }
 0x20d   :  { %v5782_v48 = vunpack.i.h.bf16 %v5780_v34  ;;  %v5781_v51 = vunpack.i.l.bf16 %v5780_v34  ;;  %v5807_v59 = vunpack.i.h.bf16 %v6738_v52  ;;  %v5806_v32 = vunpack.i.l.bf16 %v6738_v52 }
 0x20e   :  { %v751_v8 = vsel %vm331_vm9, %v548_v58, %v684_v61  ;;  %v750_v43 = vsel %vm331_vm9, %v549_v30, %v683_v57  ;;  %v738_v26 = vsel %vm277_vm3, %v732_v53, %v648_v20  ;;  %v737_v27 = vsel %vm277_vm3, %v731_v55, %v647_v63 }
 0x20f   :  { %v584_v14 = vsel %vm160_vm7, %v5781_v51, %v5782_v48  ;;  %v602_v3 = vsel %vm179_vm5, %v5806_v32, %v5807_v59  ;;  %v603_v31 = vsel %vm179_vm5, %v6680_v29, %v5806_v32  ;;  %v6787_v45 = vsel %vm277_vm3, %v733_v60, %v649_v16 }
 0x210   :  { %v702_v2 = vrot.slane %v584_v14, 4  ;;  %v5790_v4 = vpop.permute.xlu1 %5789  ;;  %v720_v1 = vrot.slane %v602_v3, 2  ;;  %v6758_v37 = vpop.permute.xlu0 %5814  ;;  %v719_v57 = vrot.slane %v603_v31, 2 }
 0x211   :  { %v5792_v7 = vunpack.i.h.bf16 %v5790_v4  ;;  %v5791_v56 = vunpack.i.l.bf16 %v5790_v4  ;;  %v5817_v21 = vunpack.i.h.bf16 %v6758_v37  ;;  %v5816_v23 = vunpack.i.l.bf16 %v6758_v37 }
 0x212   :  { %v757_v24 = vsel %vm277_vm3, %v751_v8, %v702_v2 }
 0x213   :  { %v530_v22 = vsel %vm103_vm1, %v5791_v56, %v5792_v7  ;;  %v6775_v49 = vsel %vm198_vm8, %v5817_v21, %v6684_v10  ;;  %v621_v28 = vsel %vm198_vm8, %v5816_v23, %v5817_v21  ;;  %v763_v44 = vsel %vm743_vm11, %v757_v24, %v720_v1 }
 0x214   :  { %v666_v33 = vrot.slane %v530_v22, 2  ;;  %v6777_v62 = vpop.permute.xlu1 %5799  ;;  %v5825_v5 = vpop.permute.xlu0 %5824  ;;  %v774_v53 = vpack.c.bf16 %v621_v28, %v621_v28  ;;  %v775_v58 = vpack.c.bf16 %v6775_v49, %v6775_v49 }
 0x215   :  { %v5802_v42 = vunpack.i.h.bf16 %v6777_v62  ;;  %v5801_v55 = vunpack.i.l.bf16 %v6777_v62  ;;  %v5827_v46 = vunpack.i.h.bf16 %v5825_v5  ;;  %v5826_v34 = vunpack.i.l.bf16 %v5825_v5 }
 0x216   :  { %v745_v47 = vsel %vm743_vm11, %v738_v26, %v666_v33  ;;  %v818_v21 = vsel %vm816_vm12, %v774_v53, 0 }
 0x217   :  { %v585_v32 = vsel %vm160_vm7, %v5801_v55, %v5781_v51  ;;  %v769_v61 = vpack.c.bf16 %v763_v44, %v745_v47  ;;  %v6800_v60 = vsel %vm160_vm7, %v5782_v48, %v5802_v42  ;;  %v491_v20 = vsel %vm65_vm0, %v5826_v34, %v5827_v46 }
 0x218   :  { %v701_v63 = vrot.slane %v585_v32, 4  ;;  %v492_v14 = vsel %vm65_vm0, %v5767_v40, %v5826_v34  ;;  %v5810_v16 = vpop.permute.xlu1 %5809  ;;  %v496_v51 = vsel %vm65_vm0, %v5827_v46, %v5766_v18  ;;  %v633_v2 = vrot.slane %v491_v20, 6  ;;  %v5835_v48 = vpop.permute.xlu0 %5834 }
 0x219   :  { %v632_v30 = vrot.slane %v492_v14, 6  ;;  %v5812_v3 = vunpack.i.h.bf16 %v5810_v16  ;;  %835 = vmatprep.subr.bf16.mxu1 %v769_v61  ;;  %v5811_v4 = vunpack.i.l.bf16 %v5810_v16  ;;  %v5837_v8 = vunpack.i.h.bf16 %v5835_v48 }
 0x21a   :  { %v5836_v1 = vunpack.i.l.bf16 %v5835_v48  ;;  %v703_v24 = vrot.slane %v6800_v60, 4  ;;  %v634_v22 = vrot.slane %v496_v51, 6  ;;  %v735_v40 = vsel %vm331_vm9, %v6643_v35, %v633_v2 }
 0x21b   :  { %v6818_v13 = vsel %vm103_vm1, %v5792_v7, %v5812_v3  ;;  %v531_v18 = vsel %vm103_vm1, %v5811_v4, %v5791_v56  ;;  %v756_v49 = vsel %vm277_vm3, %v750_v43, %v701_v63  ;;  %v514_v7 = vsel %vm84_vm2, %v5837_v8, %v5786_v41 }
 0x21c   :  { %v509_v26 = vsel %vm84_vm2, %v5836_v1, %v5837_v8  ;;  %v510_v31 = vsel %vm84_vm2, %v5787_v15, %v5836_v1  ;;  %v5820_v33 = vpop.permute.xlu1 %5819  ;;  %v665_v28 = vrot.slane %v531_v18, 2  ;;  %v667_v35 = vrot.slane %v6818_v13, 2  ;;  %v5850_v56 = vpop.permute.xlu0 %5849 }
 0x21d   :  { %v734_v5 = vsel %vm331_vm9, %v6622_v54, %v632_v30  ;;  %v650_v44 = vrot.slane %v510_v31, 4  ;;  %v5822_v46 = vunpack.i.h.bf16 %v5820_v33  ;;  %v5821_v34 = vunpack.i.l.bf16 %v5820_v33 }
 0x21e   :  { %v5852_v47 = vunpack.i.h.bf16 %v5850_v56  ;;  %v651_v15 = vrot.slane %v509_v26, 4  ;;  %v5851_v53 = vunpack.i.l.bf16 %v5850_v56  ;;  %v744_v43 = vsel %vm743_vm11, %v737_v27, %v665_v28  ;;  %v6877_v26 = vld [vmem:[%s8290_s3] sm:$0xff]  }
 0x21f   :  { %v762_v32 = vsel %vm743_vm11, %v756_v49, %v719_v57  ;;  %v652_v61 = vrot.slane %v514_v7, 4  ;;  %v547_v25 = vsel %vm122_vm6, %v5797_v39, %v5821_v34  ;;  %v546_v20 = vsel %vm122_vm6, %v5821_v34, %v5822_v46 }
 0x220   :  { %v532_v54 = vsel %vm103_vm1, %v5852_v47, %v5811_v4  ;;  %v5830_v41 = vpop.permute.xlu1 %5829  ;;  %v768_v63 = vpack.c.bf16 %v762_v32, %v744_v43  ;;  %v527_v14 = vsel %vm103_vm1, %v5851_v53, %v5852_v47  ;;  %v528_v27 = vsel %vm103_vm1, %v5812_v3, %v5851_v53  ;;  %v544_v57 = vpop.permute.xlu0 %543 }
 0x221   :  { %v736_v36 = vsel %vm331_vm9, %v6645_v0, %v634_v22  ;;  %v6855_v39 = vsel %vm331_vm9, %v547_v25, %v685_v17  ;;  %v670_v16 = vrot.slane %v532_v54, 2  ;;  %v5832_v51 = vunpack.i.h.bf16 %v5830_v41 }
 0x222   :  { %v5831_v30 = vunpack.i.l.bf16 %v5830_v41  ;;  %836 = vmatpush1.bf16.msra.mxu1 %v768_v63  ;;  %v668_v2 = vrot.slane %v528_v27, 2  ;;  %v669_v48 = vrot.slane %v527_v14, 2  ;;  %v545_v4 = vsel %vm122_vm6, %v5822_v46, %v544_v57 }
 0x223   :  { %v550_v3 = vsel %vm122_vm6, %v544_v57, %v6682_v9  ;;  %4822 = vmatprep.subr.msk.bf16.mxu1 %vm816_vm12, %v775_v58  ;;  %v568_v17 = vsel %vm141_vm4, %v5832_v51, %v5776_v50  ;;  %v742_v1 = vsel %vm277_vm3, %v736_v36, %v652_v61  ;;  %v740_v31 = vsel %vm277_vm3, %v734_v5, %v650_v44  ;;  %v5862_v36 = vld [vmem:[%s8290_s3 + $0x8] ss:$0 sps:$4 sm:$0x33]  }
 0x224   :  { %v563_v0 = vsel %vm141_vm4, %v5831_v30, %v5832_v51  ;;  %v564_v19 = vsel %vm141_vm4, %v5777_v38, %v5831_v30  ;;  %v5840_v8 = vpop.permute.xlu1 %5839  ;;  %v688_v9 = vrot.slane %v568_v17, 6  ;;  %v598_v58 = vpop.permute.xlu0 %597  ;;  %v749_v50 = vsel %vm743_vm11, %v742_v1, %v670_v16  ;;  %v5863_v17 = vld [vmem:[%s8292_s5 + $0xc0] sm:$0xff]  }
 0x225   :  { %v687_v22 = vrot.slane %v563_v0, 6  ;;  %v5842_v18 = vunpack.i.h.bf16 %v5840_v8  ;;  %v686_v38 = vrot.slane %v564_v19, 6  ;;  %v5841_v33 = vunpack.i.l.bf16 %v5840_v8  ;;  %v5865_v8 = vld [vmem:[%s8292_s5 + $0x40] sm:$0xff]  }
 0x226   :  { %v604_v6 = vsel %vm179_vm5, %v598_v58, %v6680_v29  ;;  %838 = vmatpush1.bf16.msra.mxu1 %v818_v21  ;;  %v747_v7 = vsel %vm743_vm11, %v740_v31, %v668_v2  ;;  %v741_v56 = vsel %vm277_vm3, %v735_v40, %v651_v15  ;;  %v755_v5 = vsel %vm331_vm9, %v550_v3, %v688_v9  ;;  %v5864_v1 = vld [vmem:[%s8292_s5 + $0x80] sm:$0xff]   ;;  %v5867_v9 = vld [vmem:[%s8292_s5 + $0xc8] sm:$0xff]   ;;  %v5872_v31 = vld [vmem:[%s8292_s5 + $0x90] sm:$0xff]  }
 0x227   :  { %v754_v49 = vsel %vm331_vm9, %v545_v4, %v687_v22  ;;  %v586_v28 = vsel %vm160_vm7, %v5842_v18, %v5801_v55  ;;  %v581_v44 = vsel %vm160_vm7, %v5841_v33, %v5842_v18  ;;  %v582_v29 = vsel %vm160_vm7, %v5802_v42, %v5841_v33  ;;  %v5866_v22 = vld [vmem:[%s8292_s5] sm:$0xff]   ;;  %v5869_v18 = vld [vmem:[%s8292_s5 + $0x48] sm:$0xff]   ;;  %v5874_v33 = vld [vmem:[%s8292_s5 + $0x10] sm:$0xff]  }
 0x228   :  { %v706_v21 = vrot.slane %v586_v28, 4  ;;  %v5845_v46 = vpop.permute.xlu1 %5844  ;;  %v704_v34 = vrot.slane %v582_v29, 4  ;;  %v724_v47 = vrot.slane %v604_v6, 2  ;;  %v616_v43 = vpop.permute.xlu0 %615  ;;  %v705_v40 = vrot.slane %v581_v44, 4  ;;  %v5875_v6 = vld [vmem:[%s8292_s5 + $0xd8] sm:$0xff]   ;;  %v5879_v28 = vld [vmem:[%s8292_s5 + $0xe0] sm:$0xff]  }
 0x229   :  { %v5847_v53 = vunpack.i.h.bf16 %v5845_v46  ;;  %v5846_v55 = vunpack.i.l.bf16 %v5845_v46  ;;  %4823 = vmatmul.mubr.msk.bf16.vlgmr.msra.gmra.mrb[4].mxu1 %vm809_vm13, %v6877_v26  ;;  %v622_v15 = vsel %vm198_vm8, %v616_v43, %v5816_v23  ;;  %v753_v42 = vsel %vm331_vm9, %v546_v20, %v686_v38  ;;  %v5873_v38 = vld [vmem:[%s8292_s5 + $0x50] sm:$0xff]   ;;  %v5883_v44 = vld [vmem:[%s8292_s5 + $0xe8] sm:$0xff]   ;;  %v5882_v29 = vld [vmem:[%s8292_s5 + $0x20] sm:$0xff]  }
 0x22a   :  { %v761_v62 = vsel %vm277_vm3, %v755_v5, %v706_v21  ;;  %877 = vmatprep.mubr.bf16.mxu1 %v6228_v12  ;;  %v748_v25 = vsel %vm743_vm11, %v741_v56, %v669_v48  ;;  %v759_v52 = vsel %vm277_vm3, %v753_v42, %v704_v34  ;;  %v746_v51 = vsel %vm743_vm11, %v6787_v45, %v667_v35  ;;  %v5881_v56 = vld [vmem:[%s8292_s5 + $0x60] sm:$0xff]   ;;  %v5885_v21 = vld [vmem:[%s8292_s5 + $0x68] sm:$0xff]   ;;  %v5894_v42 = vld [vmem:[%s8292_s5 + $0x38] sm:$0xff]  }
 0x22b   :  { %v599_v32 = vsel %vm179_vm5, %v5847_v53, %v598_v58  ;;  %v600_v61 = vsel %vm179_vm5, %v5846_v55, %v5847_v53  ;;  %v601_v37 = vsel %vm179_vm5, %v5807_v59, %v5846_v55  ;;  %v767_v14 = vsel %vm743_vm11, %v761_v62, %v724_v47  ;;  %v5868_v58 = vld [vmem:[%s8292_s5 + $0x88] sm:$0xff]   ;;  %v5880_v5 = vld [vmem:[%s8292_s5 + $0xa0] sm:$0xff]   ;;  %v5887_v47 = vld [vmem:[%s8292_s5 + $0xf0] sm:$0xff]  }
 0x22c   :  { %v721_v23 = vrot.slane %v601_v37, 2  ;;  %v722_v54 = vrot.slane %v600_v61, 2  ;;  %v723_v41 = vrot.slane %v599_v32, 2  ;;  %v5855_v63 = vpop.permute.xlu1 %5854  ;;  %v773_v57 = vpack.c.bf16 %v767_v14, %v749_v50  ;;  %v5876_v50 = vld [vmem:[%s8292_s5 + $0x98] sm:$0xff]   ;;  %v5884_v46 = vld [vmem:[%s8292_s5 + $0xa8] sm:$0xff]   ;;  %v5888_v53 = vld [vmem:[%s8292_s5 + $0xb0] sm:$0xff]  }
 0x22d   :  { %v5857_v20 = vunpack.i.h.bf16 %v5855_v63  ;;  %v5856_v27 = vunpack.i.l.bf16 %v5855_v63  ;;  %v760_v59 = vsel %vm277_vm3, %v754_v49, %v705_v40  ;;  %v758_v30 = vsel %vm277_vm3, %v6855_v39, %v703_v24  ;;  %v5877_v49 = vld [vmem:[%s8292_s5 + $0x58] sm:$0xff]   ;;  %v5886_v34 = vld [vmem:[%s8292_s5 + $0x28] sm:$0xff]   ;;  %v5889_v55 = vld [vmem:[%s8292_s5 + $0x70] sm:$0xff]  }
 0x22e   :  { %v765_v16 = vsel %vm743_vm11, %v759_v52, %v722_v54  ;;  %934 = vmatprep.subr.bf16.mxu1 %v773_v57  ;;  %v766_v4 = vsel %vm743_vm11, %v760_v59, %v723_v41  ;;  %v764_v3 = vsel %vm743_vm11, %v758_v30, %v721_v23  ;;  %v779_v35 = vpack.c.bf16 %v622_v15, %v622_v15  ;;  %v5891_v40 = vld [vmem:[%s8292_s5 + $0xf8] sm:$0xff]   ;;  %v5895_v32 = vld [vmem:[%s8292_s5 + $0x1c0] sm:$0xff]  }
 0x22f   :  { %v618_v2 = vsel %vm198_vm8, %v5856_v27, %v5857_v20  ;;  %v771_v48 = vpack.c.bf16 %v765_v16, %v747_v7  ;;  %v772_v19 = vpack.c.bf16 %v766_v4, %v748_v25  ;;  %v770_v13 = vpack.c.bf16 %v764_v3, %v746_v51  ;;  %v5878_v7 = vld [vmem:[%s8292_s5 + $0x18] sm:$0xff]   ;;  %v5897_v61 = vld [vmem:[%s8292_s5 + $0x140] sm:$0xff]  }
 0x230   :  { %v777_v0 = vpack.c.bf16 %v618_v2, %v618_v2  ;;  %v617_v45 = vsel %vm198_vm8, %v5857_v20, %v616_v43  ;;  %v619_v24 = vsel %vm198_vm8, %v6684_v10, %v5856_v27  ;;  %v5890_v43 = vld [vmem:[%s8292_s5 + $0x30] sm:$0xff]   ;;  %v5892_v15 = vld [vmem:[%s8292_s5 + $0xb8] sm:$0xff]   ;;  %vm4741_vm0 = vcmask 261120  }
 0x231   :  { %4824 = vmatmul.mubr.msk.bf16.gmra.mrb[8].mxu1 %vm809_vm13, %v5862_v36  ;;  %886 = vmatprep.subr.bf16.mxu0 %v771_v48  ;;  %v778_v60 = vpack.c.bf16 %v617_v45, %v617_v45  ;;  %v776_v39 = vpack.c.bf16 %v619_v24, %v619_v24  ;;  %v5893_v62 = vld [vmem:[%s8292_s5 + $0x78] sm:$0xff]   ;;  %vm4785_vm1 = vcmask 41984  }
 0x232   :  { %935 = vmatpush1.bf16.msra.mxu1 %v772_v19  ;;  %887 = vmatpush1.bf16.msra.mxu0 %v770_v13 }
 0x233   :  { %4828 = vmatprep.subr.msk.bf16.mxu1 %vm816_vm12, %v779_v35  ;;  %4825 = vmatprep.subr.msk.bf16.mxu0 %vm816_vm12, %v777_v0  ;;  %v830_v11 = vsel %vm816_vm12, %v778_v60, 0  ;;  %v824_v10 = vsel %vm816_vm12, %v776_v39, 0 }
 0x234   :  { %966 = vmatprep.mubr.bf16.mxu1 %v6228_v12 }
 0x236   :  { %937 = vmatpush1.bf16.msra.mxu1 %v830_v11  ;;  %889 = vmatpush1.bf16.msra.mxu0 %v824_v10 }
 0x237   :  { %5214 = vmatprep.subr.bf16.mxu1 %v5863_v17  ;;  %5192 = vmatprep.subr.bf16.mxu0 %v5865_v8 }
 0x239   :  { %4829 = vmatmul.mubr.msk.bf16.vlgmr.msra.gmra.mrb[12].mxu1 %vm809_vm13, %v6877_v26  ;;  %4826 = vmatmul.mubr.msk.bf16.vlgmr.msra.gmra.mrb[8].mxu0 %vm809_vm13, %v6877_v26  ;;  %v5870_v26 = vld [vmem:[%s8292_s5 + $0x8] sm:$0xff]  }
 0x23a   :  { %974 = vmatprep.mubr.bf16.mxu1 %v6228_v12  ;;  %926 = vmatprep.mubr.bf16.mxu0 %v6228_v12  ;;  %v5871_v12 = vld [vmem:[%s8292_s5 + $0xd0] sm:$0xff]  }
 0x23b   :  { %5215 = vmatpush3.bf16.msra.mxu1 %v5864_v1  ;;  %5193 = vmatpush3.bf16.msra.mxu0 %v5866_v22 }
 0x23c   :  { %5216 = vmatprep.subr.bf16.mxu1 %v5867_v9  ;;  %5194 = vmatprep.subr.bf16.mxu0 %v5869_v18 }
 0x23d   :  { %v789_v41 = vpop.permute.xlu1 %788 }
 0x23f   :  { %5217 = vmatpush3.bf16.msra.mxu1 %v5868_v58  ;;  %5195 = vmatpush3.bf16.msra.mxu0 %v5870_v26 }
 0x240   :  { %5218 = vmatprep.subr.bf16.mxu1 %v5871_v12  ;;  %5196 = vmatprep.subr.bf16.mxu0 %v5873_v38 }
 0x241   :  { %4830 = vmatmul.mubr.msk.bf16.gmra.mrb[16].mxu1 %vm809_vm13, %v5862_v36  ;;  %4827 = vmatmul.mubr.msk.bf16.gmra.mrb[12].mxu0 %vm809_vm13, %v5862_v36  ;;  %v7060_v36 = vpop.permute.xlu0 %793 }
 0x243   :  { %5219 = vmatpush3.bf16.msra.mxu1 %v5872_v31  ;;  %5197 = vmatpush3.bf16.msra.mxu0 %v5874_v33 }
 0x244   :  { %5220 = vmatprep.subr.bf16.mxu1 %v5875_v6  ;;  %5198 = vmatprep.subr.bf16.mxu0 %v5877_v49 }
 0x247   :  { %5221 = vmatpush3.bf16.msra.mxu1 %v5876_v50  ;;  %5199 = vmatpush3.bf16.msra.mxu0 %v5878_v7 }
 0x248   :  { %5222 = vmatprep.subr.bf16.mxu1 %v5879_v28  ;;  %5200 = vmatprep.subr.bf16.mxu0 %v5881_v56 }
 0x24b   :  { %5223 = vmatpush3.bf16.msra.mxu1 %v5880_v5  ;;  %5201 = vmatpush3.bf16.msra.mxu0 %v5882_v29  ;;  %v5896_v5 = vld [vmem:[%s8292_s5 + $0x180] sm:$0xff]  }
 0x24c   :  { %5224 = vmatprep.subr.bf16.mxu1 %v5883_v44  ;;  %5202 = vmatprep.subr.bf16.mxu0 %v5885_v21  ;;  %v7100_v21 = vpop.permute.xlu1 %798 }
 0x24f   :  { %5225 = vmatpush3.bf16.msra.mxu1 %v5884_v46  ;;  %5203 = vmatpush3.bf16.msra.mxu0 %v5886_v34 }
 0x250   :  { %5226 = vmatprep.subr.bf16.mxu1 %v5887_v47  ;;  %5204 = vmatprep.subr.bf16.mxu0 %v5889_v55 }
 0x253   :  { %5227 = vmatpush3.bf16.msra.mxu1 %v5888_v53  ;;  %5205 = vmatpush3.bf16.msra.mxu0 %v5890_v43 }
 0x254   :  { %5228 = vmatprep.subr.bf16.mxu1 %v5891_v40  ;;  %5206 = vmatprep.subr.bf16.mxu0 %v5893_v62 }
 0x257   :  { %5229 = vmatpush3.bf16.msra.mxu1 %v5892_v15  ;;  %5207 = vmatpush3.bf16.msra.mxu0 %v5894_v42  ;;  %v5898_v42 = vld [vmem:[%s8292_s5 + $0x100] sm:$0xff]  }
 0x258   :  { %5258 = vmatprep.subr.bf16.mxu1 %v5895_v32  ;;  %5236 = vmatprep.subr.bf16.mxu0 %v5897_v61 }
 0x2fc   :  { %v869_v37 = vpop.f32.mrb[4].mxu1 }
 0x2fd   :  { %v871_v25 = vpop.f32.mrb[5].mxu1  ;;  %v870_v63 = vadd.f32 %v869_v37, %v789_v41 }
 0x2fe   :  { %v873_v23 = vpop.f32.mrb[6].mxu1  ;;  %v872_v27 = vadd.f32 %v871_v25, %v789_v41 }
 0x2ff   :  { %v875_v54 = vpop.f32.mrb[7].mxu1  ;;  %v874_v16 = vadd.f32 %v873_v23, %v7060_v36  ;;  %v7063_v59 = vmax.f32 %v870_v63, 0.0 }
 0x300   :  { %v876_v51 = vadd.f32 %v875_v54, %v7060_v36  ;;  %v7066_v30 = vmax.f32 %v872_v27, 0.0  ;;  %v5899_v54 = vld [vmem:[%s8292_s5 + $0x1c8] sm:$0xff]  }
 0x301   :  { %v7068_v2 = vmax.f32 %v874_v16, 0.0  ;;  %v996_v3 = vrot.slane %v7063_v59, 1  ;;  %v1004_v35 = vrot.slane %v7063_v59, 3  ;;  %v1000_v60 = vrot.slane %v7063_v59, 2  ;;  %v5900_v16 = vld [vmem:[%s8292_s5 + $0x188] sm:$0xff]  }
 0x302   :  { %v7071_v0 = vmax.f32 %v876_v51, 0.0  ;;  %v997_v8 = vrot.slane %v7066_v30, 1  ;;  %v1005_v11 = vrot.slane %v7066_v30, 3  ;;  %v1001_v10 = vrot.slane %v7066_v30, 2 }
 0x303   :  { %v1013_v18 = vrot.slane %v7066_v30, 5  ;;  %v1009_v58 = vrot.slane %v7066_v30, 4  ;;  %v1012_v26 = vrot.slane %v7063_v59, 5  ;;  %v1021_v31 = vrot.slane %v7066_v30, 7 }
 0x304   :  { %v7056_v14 = vpop.f32.mrb[8].mxu1  ;;  %v1008_v38 = vrot.slane %v7063_v59, 4  ;;  %v1017_v33 = vrot.slane %v7066_v30, 6  ;;  %v1020_v28 = vrot.slane %v7063_v59, 7  ;;  %v1027_v29 = vrot.slane %v7071_v0, 1 }
 0x305   :  { %v7058_v20 = vpop.f32.mrb[9].mxu1 }
 0x306   :  { %v883_v57 = vpop.f32.mrb[10].mxu1 }
 0x307   :  { %v884_v52 = vpop.f32.mrb[11].mxu1 }
 0x30c   :  { %v968_v48 = vpop.f32.mrb[12].mxu1  ;;  %v920_v4 = vpop.f32.mrb[8].mxu0 }
 0x30d   :  { %v969_v19 = vadd.f32 %v968_v48, %v789_v41  ;;  %v970_v13 = vpop.f32.mrb[13].mxu1  ;;  %v921_v45 = vpop.f32.mrb[9].mxu0 }
 0x30e   :  { %v922_v24 = vadd.f32 %v921_v45, %v789_v41  ;;  %v971_v39 = vpop.f32.mrb[14].mxu1  ;;  %v923_v17 = vpop.f32.mrb[10].mxu0  ;;  %v5901_v41 = vld [vmem:[%s8292_s5 + $0x148] sm:$0xff]  }
 0x30f   :  { %v7078_v1 = vmax.f32 %v969_v19, 0.0  ;;  %v924_v22 = vpop.f32.mrb[11].mxu0  ;;  %v973_v9 = vpop.f32.mrb[15].mxu1  ;;  %v972_v61 = vadd.f32 %v971_v39, %v7060_v36  ;;  %v880_v19 = vadd.f32 %v7056_v14, %v7100_v21  ;;  %v5902_v14 = vld [vmem:[%s8292_s5 + $0x108] sm:$0xff]  }
 0x310   :  { %v7083_v12 = vmax.f32 %v922_v24, 0.0  ;;  %v925_v57 = vadd.f32 %v924_v22, %v7060_v36  ;;  %v5903_v36 = vld [vmem:[%s8292_s5 + $0x1d0] sm:$0xff]  }
 0x311   :  { %v1187_v6 = vsel %vm816_vm12, %v997_v8, %v7078_v1  ;;  %v1083_v50 = vrot.slane %v7078_v1, 7  ;;  %v4836_v49 = vrot.slane %v7078_v1, 10  ;;  %v4834_v53 = vrot.slane %v7078_v1, 9  ;;  %v5905_v9 = vld [vmem:[%s8292_s5 + $0x150] sm:$0xff]  }
 0x312   :  { %v1227_v7 = vpack.c.bf16 %v1187_v6, %v1187_v6  ;;  %v1186_v56 = vsel %vm816_vm12, %v996_v3, %v7083_v12  ;;  %v1082_v44 = vrot.slane %v7083_v12, 7  ;;  %v4835_v32 = vrot.slane %v7083_v12, 10 }
 0x313   :  { %v1185_v46 = vsel %vm816_vm12, %v7066_v30, %v1083_v50  ;;  %v1226_v34 = vpack.c.bf16 %v1186_v56, %v1186_v56  ;;  %v1191_v47 = vsel %vm816_vm12, %v1005_v11, %v4836_v49  ;;  %v1189_v23 = vsel %vm816_vm12, %v1001_v10, %v4834_v53  ;;  %v5904_v56 = vld [vmem:[%s8292_s5 + $0x190] sm:$0xff]  }
 0x314   :  { %v7106_v55 = vpop.f32.mrb[16].mxu1  ;;  %3903 = vmatprep.mubr.bf16.mxu1 %v1227_v7  ;;  %v928_v43 = vpop.f32.mrb[12].mxu0  ;;  %v1225_v40 = vpack.c.bf16 %v1185_v46, %v1185_v46  ;;  %v1231_v15 = vpack.c.bf16 %v1191_v47, %v1191_v47  ;;  %v1184_v62 = vsel %vm816_vm12, %v7063_v59, %v1082_v44  ;;  %v4840_v63 = vrot.slane %v7078_v1, 12 }
 0x315   :  { %v929_v37 = vpop.f32.mrb[13].mxu0  ;;  %3904 = vmatmul.mubr.bf16.vlgmr.msra.gmra.mrb[20].mxu1 %v1226_v34  ;;  %v1224_v25 = vpack.c.bf16 %v1184_v62, %v1184_v62  ;;  %v978_v27 = vpop.f32.mrb[17].mxu1  ;;  %v1229_v52 = vpack.c.bf16 %v1189_v23, %v1189_v23  ;;  %v7130_v51 = vsel %vm816_vm12, %v1004_v35, %v4835_v32  ;;  %v4833_v48 = vrot.slane %v7083_v12, 9 }
 0x316   :  { %3863 = vmatprep.mubr.bf16.mxu0 %v1225_v40  ;;  %5259 = vmatpush3.bf16.msra.mxu1 %v5896_v5  ;;  %v979_v4 = vpop.f32.mrb[18].mxu1  ;;  %v931_v3 = vpop.f32.mrb[14].mxu0  ;;  %v7139_v13 = vsel %vm816_vm12, %v1013_v18, %v4840_v63  ;;  %v4838_v45 = vrot.slane %v7078_v1, 11  ;;  %v1016_v35 = vrot.slane %v7063_v59, 6  ;;  %v4839_v8 = vrot.slane %v7083_v12, 12 }
 0x317   :  { %3983 = vmatprep.mubr.bf16.mxu1 %v1231_v15  ;;  %3864 = vmatmul.mubr.bf16.vlgmr.msra.gmra.mrb[16].mxu0 %v1224_v25  ;;  %v980_v24 = vpop.f32.mrb[19].mxu1  ;;  %v932_v39 = vpop.f32.mrb[15].mxu0  ;;  %v7149_v17 = vsel %vm816_vm12, %v1000_v60, %v4833_v48  ;;  %v1026_v11 = vrot.slane %v7068_v2, 1  ;;  %v1035_v10 = vrot.slane %v7071_v0, 3  ;;  %v7154_v22 = vmax.f32 %v972_v61, 0.0  ;;  %v5911_v61 = vld [vmem:[%s8292_s5 + $0x1e0] sm:$0xff]  }
 0x318   :  { %5237 = vmatpush3.bf16.msra.mxu0 %v5898_v42  ;;  %3943 = vmatprep.mubr.bf16.mxu0 %v1229_v52  ;;  %v7162_v18 = vsel %vm816_vm12, %v1009_v58, %v4838_v45  ;;  %v1121_v60 = vrot.slane %v1083_v50, 7  ;;  %v4837_v6 = vrot.slane %v7083_v12, 11  ;;  %v882_v49 = vadd.f32 %v7058_v20, %v7100_v21  ;;  %v5907_v58 = vld [vmem:[%s8292_s5 + $0x1d8] sm:$0xff]   ;;  %v5915_v45 = vld [vmem:[%s8292_s5 + $0x1e8] sm:$0xff]  }
 0x319   :  { %5260 = vmatprep.subr.bf16.mxu1 %v5899_v54  ;;  %5238 = vmatprep.subr.bf16.mxu0 %v5901_v41  ;;  %v7167_v7 = vmax.f32 %v925_v57, 0.0  ;;  %v1031_v5 = vrot.slane %v7071_v0, 2  ;;  %v1034_v46 = vrot.slane %v7068_v2, 3  ;;  %v7180_v20 = vsel %vm816_vm12, %v1012_v26, %v4839_v8  ;;  %v5906_v26 = vld [vmem:[%s8292_s5 + $0x110] sm:$0xff]   ;;  %v5908_v42 = vld [vmem:[%s8292_s5 + $0x198] sm:$0xff]   ;;  %v5913_v41 = vld [vmem:[%s8292_s5 + $0x160] sm:$0xff]  }
 0x31a   :  { %5261 = vmatpush3.bf16.msra.mxu1 %v5900_v16  ;;  %v7185_v50 = vsel %vm816_vm12, %v1021_v31, %v1121_v60  ;;  %v7190_v34 = vsel %vm816_vm12, %v1008_v38, %v4837_v6  ;;  %v4842_v47 = vrot.slane %v7078_v1, 13  ;;  %v7193_v53 = vmax.f32 %v880_v19, 0.0  ;;  %v5909_v38 = vld [vmem:[%s8292_s5 + $0x158] sm:$0xff]   ;;  %v5912_v16 = vld [vmem:[%s8292_s5 + $0x1a0] sm:$0xff]   ;;  %v5917_v60 = vld [vmem:[%s8292_s5 + $0x168] sm:$0xff]  }
 0x31b   :  { %5262 = vmatprep.subr.bf16.mxu1 %v5903_v36  ;;  %v930_v43 = vadd.f32 %v929_v37, %v7100_v21  ;;  %v1120_v31 = vrot.slane %v1082_v44, 7  ;;  %v1043_v40 = vrot.slane %v7071_v0, 5  ;;  %v7214_v15 = vsel %vm816_vm12, %v1027_v29, %v7154_v22 }
 0x31c   :  { %5239 = vmatpush3.bf16.msra.mxu0 %v5902_v14  ;;  %v7208_v1 = vsel %vm816_vm12, %v1017_v33, %v4842_v47  ;;  %v4841_v44 = vrot.slane %v7083_v12, 13  ;;  %v1099_v62 = vrot.slane %v7154_v22, 7  ;;  %v7228_v33 = vsel %vm816_vm12, %v1026_v11, %v7167_v7  ;;  %v5914_v14 = vld [vmem:[%s8292_s5 + $0x120] sm:$0xff]  }
 0x31d   :  { %5240 = vmatprep.subr.bf16.mxu0 %v5905_v9  ;;  %v7224_v30 = vsel %vm816_vm12, %v1020_v28, %v1120_v31  ;;  %v1030_v29 = vrot.slane %v7068_v2, 2  ;;  %v1039_v12 = vrot.slane %v7071_v0, 4  ;;  %v977_v32 = vadd.f32 %v7106_v55, %v7100_v21  ;;  %v5910_v21 = vld [vmem:[%s8292_s5 + $0x118] sm:$0xff]  }
 0x31e   :  { %5263 = vmatpush3.bf16.msra.mxu1 %v5904_v56  ;;  %v7238_v59 = vsel %vm816_vm12, %v1016_v35, %v4841_v44  ;;  %v7242_v28 = vsel %vm816_vm12, %v7071_v0, %v1099_v62  ;;  %v1042_v37 = vrot.slane %v7068_v2, 5  ;;  %v7245_v25 = vmax.f32 %v882_v49, 0.0 }
 0x31f   :  { %5264 = vmatprep.subr.bf16.mxu1 %v5907_v58  ;;  %v7247_v23 = vmax.f32 %v930_v43, 0.0  ;;  %v4848_v55 = vrot.slane %v7154_v22, 10  ;;  %v1098_v54 = vrot.slane %v7167_v7, 7  ;;  %v4846_v63 = vrot.slane %v7154_v22, 9 }
 0x320   :  { %5241 = vmatpush3.bf16.msra.mxu0 %v5906_v26  ;;  %v4847_v27 = vrot.slane %v7167_v7, 10  ;;  %v4852_v57 = vrot.slane %v7154_v22, 12  ;;  %v4845_v52 = vrot.slane %v7167_v7, 9  ;;  %v4850_v3 = vrot.slane %v7154_v22, 11  ;;  %v5919_v26 = vld [vmem:[%s8292_s5 + $0x1f0] sm:$0xff]  }
 0x321   :  { %5242 = vmatprep.subr.bf16.mxu0 %v5909_v38  ;;  %v7265_v48 = vsel %vm816_vm12, %v1035_v10, %v4848_v55  ;;  %v7269_v4 = vsel %vm816_vm12, %v7068_v2, %v1098_v54  ;;  %v4851_v19 = vrot.slane %v7167_v7, 12  ;;  %v7273_v36 = vmax.f32 %v977_v32, 0.0 }
 0x322   :  { %5265 = vmatpush3.bf16.msra.mxu1 %v5908_v42  ;;  %v7279_v35 = vsel %vm816_vm12, %v1031_v5, %v4846_v63  ;;  %v7282_v24 = vsel %vm816_vm12, %v1034_v46, %v4847_v27  ;;  %v1051_v39 = vrot.slane %v7071_v0, 7  ;;  %v7289_v8 = vsel %vm816_vm12, %v1043_v40, %v4852_v57  ;;  %v5923_v63 = vld [vmem:[%s8292_s5 + $0x1f8] sm:$0xff]  }
 0x323   :  { %5266 = vmatprep.subr.bf16.mxu1 %v5911_v61  ;;  %v7292_v11 = vsel %vm816_vm12, %v1030_v29, %v4845_v52  ;;  %v1038_v10 = vrot.slane %v7068_v2, 4  ;;  %v1047_v9 = vrot.slane %v7071_v0, 6  ;;  %v7300_v6 = vsel %vm816_vm12, %v1039_v12, %v4850_v3  ;;  %v5916_v0 = vld [vmem:[%s8292_s5 + $0x1a8] sm:$0xff]   ;;  %v5922_v3 = vld [vmem:[%s8292_s5 + $0x130] sm:$0xff]  }
 0x324   :  { %5243 = vmatpush3.bf16.msra.mxu0 %v5910_v21  ;;  %v7303_v49 = vsel %vm816_vm12, %v1042_v37, %v4851_v19  ;;  %v1050_v56 = vrot.slane %v7068_v2, 7  ;;  %v1057_v5 = vrot.slane %v7245_v25, 1  ;;  %v1136_v46 = vrot.slane %v7247_v23, 7  ;;  %v5920_v21 = vld [vmem:[%s8292_s5 + $0x1b0] sm:$0xff]  }
 0x325   :  { %5244 = vmatprep.subr.bf16.mxu0 %v5913_v41  ;;  %v1135_v58 = vrot.slane %v1099_v62, 7  ;;  %v4849_v47 = vrot.slane %v7167_v7, 11  ;;  %v1046_v43 = vrot.slane %v7068_v2, 6  ;;  %v4854_v31 = vrot.slane %v7154_v22, 13  ;;  %v5918_v2 = vld [vmem:[%s8292_s5 + $0x128] sm:$0xff]  }
 0x326   :  { %5267 = vmatpush3.bf16.msra.mxu1 %v5912_v16  ;;  %v1134_v40 = vrot.slane %v1098_v54, 7  ;;  %v7319_v38 = vsel %vm816_vm12, %v1057_v5, %v7273_v36  ;;  %v4853_v44 = vrot.slane %v7167_v7, 13  ;;  %v4859_v62 = vrot.slane %v7247_v23, 10  ;;  %v5921_v7 = vld [vmem:[%s8292_s5 + $0x170] sm:$0xff]   ;;  %v5928_v5 = vld [vmem:[%s8292_s5 + $0x280] sm:$0xff]  }
 0x327   :  { %5268 = vmatprep.subr.bf16.mxu1 %v5915_v45  ;;  %v7327_v42 = vsel %vm816_vm12, %v1051_v39, %v1135_v58  ;;  %v7330_v29 = vsel %vm816_vm12, %v1038_v10, %v4849_v47  ;;  %v1137_v22 = vrot.slane %v7273_v36, 7  ;;  %v4857_v12 = vrot.slane %v7247_v23, 9  ;;  %v5930_v47 = vld [vmem:[%s8292_s5 + $0x200] sm:$0xff]  }
 0x328   :  { %5245 = vmatpush3.bf16.msra.mxu0 %v5914_v14  ;;  %v7338_v32 = vsel %vm816_vm12, %v1047_v9, %v4854_v31  ;;  %v7341_v61 = vsel %vm816_vm12, %v1050_v56, %v1134_v40  ;;  %v1056_v37 = vrot.slane %v7193_v53, 1  ;;  %v7348_v55 = vsel %vm816_vm12, %v1046_v43, %v4853_v44  ;;  %v5925_v14 = vld [vmem:[%s8292_s5 + $0x178] sm:$0xff]   ;;  %v5929_v56 = vld [vmem:[%s8292_s5 + $0x240] sm:$0xff]   ;;  %v5934_v31 = vld [vmem:[%s8292_s5 + $0x208] sm:$0xff]  }
 0x329   :  { %5246 = vmatprep.subr.bf16.mxu0 %v5917_v60  ;;  %v7352_v54 = vsel %vm816_vm12, %v7245_v25, %v1137_v22  ;;  %v1064_v41 = vrot.slane %v7193_v53, 3  ;;  %v1065_v57 = vrot.slane %v7245_v25, 3  ;;  %v4860_v52 = vrot.slane %v7273_v36, 10  ;;  %v5926_v60 = vld [vmem:[%s8292_s5 + $0x138] sm:$0xff]   ;;  %v5936_v40 = vld [vmem:[%s8292_s5 + $0x290] sm:$0xff]  }
 0x32a   :  { %5269 = vmatpush3.bf16.msra.mxu1 %v5916_v0  ;;  %v7360_v27 = vsel %vm816_vm12, %v1056_v37, %v7247_v23  ;;  %v1060_v16 = vrot.slane %v7193_v53, 2  ;;  %v7370_v19 = vsel %vm816_vm12, %v7193_v53, %v1136_v46  ;;  %v1061_v45 = vrot.slane %v7245_v25, 2  ;;  %v5924_v53 = vld [vmem:[%s8292_s5 + $0x1b8] sm:$0xff]   ;;  %v5931_v0 = vld [vmem:[%s8292_s5 + $0x2c8] sm:$0xff]   ;;  %v5945_v37 = vld [vmem:[%s8292_s5 + $0x260] sm:$0xff]  }
 0x32b   :  { %5270 = vmatprep.subr.bf16.mxu1 %v5919_v26  ;;  %v4858_v23 = vrot.slane %v7273_v36, 9  ;;  %v7375_v39 = vsel %vm816_vm12, %v1064_v41, %v4859_v62  ;;  %v7381_v10 = vsel %vm816_vm12, %v1065_v57, %v4860_v52  ;;  %v5927_v36 = vld [vmem:[%s8292_s5 + $0x2c0] sm:$0xff]   ;;  %v1230_v46 = vpack.c.bf16 %v7130_v51, %v7130_v51  ;;  %v5933_v51 = vld [vmem:[%s8292_s5 + $0x248] sm:$0xff]   ;;  %v5939_v44 = vld [vmem:[%s8292_s5 + $0x2d8] sm:$0xff]  }
 0x32c   :  { %5247 = vmatpush3.bf16.msra.mxu0 %v5918_v2  ;;  %v7384_v9 = vsel %vm816_vm12, %v1060_v16, %v4857_v12  ;;  %v1235_v58 = vpack.c.bf16 %v7139_v13, %v7139_v13  ;;  %v1228_v43 = vpack.c.bf16 %v7149_v17, %v7149_v17  ;;  %v1233_v26 = vpack.c.bf16 %v7162_v18, %v7162_v18  ;;  %v5932_v13 = vld [vmem:[%s8292_s5 + $0x288] sm:$0xff]   ;;  %v5935_v17 = vld [vmem:[%s8292_s5 + $0x2d0] sm:$0xff]   ;;  %v5941_v2 = vld [vmem:[%s8292_s5 + $0x258] sm:$0xff]  }
 0x32d   :  { %5248 = vmatprep.subr.bf16.mxu0 %v5921_v7  ;;  %v7390_v25 = vsel %vm816_vm12, %v1061_v45, %v4858_v23  ;;  %v5937_v18 = vld [vmem:[%s8292_s5 + $0x250] sm:$0xff]   ;;  %v5940_v22 = vld [vmem:[%s8292_s5 + $0x298] sm:$0xff]   ;;  %v5943_v12 = vld [vmem:[%s8292_s5 + $0x2e0] sm:$0xff]  }
 0x32e   :  { %5271 = vmatpush3.bf16.msra.mxu1 %v5920_v21  ;;  %v5938_v62 = vld [vmem:[%s8292_s5 + $0x210] sm:$0xff]   ;;  %v5942_v7 = vld [vmem:[%s8292_s5 + $0x218] sm:$0xff]   ;;  %v5944_v21 = vld [vmem:[%s8292_s5 + $0x2a0] sm:$0xff]  }
 0x32f   :  { %5272 = vmatprep.subr.bf16.mxu1 %v5923_v63  ;;  %v5947_v41 = vld [vmem:[%s8292_s5 + $0x2e8] sm:$0xff]   ;;  %v5946_v63 = vld [vmem:[%s8292_s5 + $0x220] sm:$0xff]   ;;  %v5951_v16 = vld [vmem:[%s8292_s5 + $0x2f0] sm:$0xff]  }
 0x330   :  { %5249 = vmatpush3.bf16.msra.mxu0 %v5922_v3  ;;  %v5949_v57 = vld [vmem:[%s8292_s5 + $0x268] sm:$0xff]   ;;  %v5953_v45 = vld [vmem:[%s8292_s5 + $0x270] sm:$0xff]  }
 0x331   :  { %5250 = vmatprep.subr.bf16.mxu0 %v5925_v14  ;;  %v5948_v52 = vld [vmem:[%s8292_s5 + $0x2a8] sm:$0xff]   ;;  %v5952_v23 = vld [vmem:[%s8292_s5 + $0x2b0] sm:$0xff]   ;;  %v5955_v14 = vld [vmem:[%s8292_s5 + $0x2f8] sm:$0xff]  }
 0x332   :  { %5273 = vmatpush3.bf16.msra.mxu1 %v5924_v53  ;;  %v5950_v3 = vld [vmem:[%s8292_s5 + $0x228] sm:$0xff]   ;;  %v5954_v53 = vld [vmem:[%s8292_s5 + $0x230] sm:$0xff]  }
 0x333   :  { %5302 = vmatprep.subr.bf16.mxu1 %v5927_v36  ;;  %v5957_v36 = vld [vmem:[%s8292_s5 + $0x278] sm:$0xff]  }
 0x334   :  { %5251 = vmatpush3.bf16.msra.mxu0 %v5926_v60  ;;  %v5956_v60 = vld [vmem:[%s8292_s5 + $0x2b8] sm:$0xff]  }
 0x335   :  { %3984 = vmatmul.mubr.bf16.vlgmr.msra.gmra.mrb[24].mxu1 %v1230_v46  ;;  %5280 = vmatprep.subr.bf16.mxu0 %v5929_v56  ;;  %v5959_v56 = vld [vmem:[%s8292_s5 + $0x3c0] sm:$0xff]  }
 0x336   :  { %5303 = vmatpush3.bf16.msra.mxu1 %v5928_v5  ;;  %4063 = vmatprep.mubr.bf16.mxu1 %v1235_v58  ;;  %v5958_v5 = vld [vmem:[%s8292_s5 + $0x238] sm:$0xff]   ;;  %v5961_v46 = vld [vmem:[%s8292_s5 + $0x340] sm:$0xff]   ;;  %v1234_v58 = vpack.c.bf16 %v7180_v20, %v7180_v20  ;;  %v5965_v20 = vld [vmem:[%s8292_s5 + $0x348] sm:$0xff]  }
 0x337   :  { %3944 = vmatmul.mubr.bf16.vlgmr.msra.gmra.mrb[20].mxu0 %v1228_v43  ;;  %5304 = vmatprep.subr.bf16.mxu1 %v5931_v0  ;;  %v5960_v0 = vld [vmem:[%s8292_s5 + $0x380] sm:$0xff]   ;;  %v1239_v43 = vpack.c.bf16 %v7185_v50, %v7185_v50  ;;  %v5964_v50 = vld [vmem:[%s8292_s5 + $0x388] sm:$0xff]  }
 0x338   :  { %5281 = vmatpush3.bf16.msra.mxu0 %v5930_v47  ;;  %4023 = vmatprep.mubr.bf16.mxu0 %v1233_v26  ;;  %v5963_v47 = vld [vmem:[%s8292_s5 + $0x3c8] sm:$0xff]   ;;  %v1232_v26 = vpack.c.bf16 %v7190_v34, %v7190_v34  ;;  %v5967_v34 = vld [vmem:[%s8292_s5 + $0x3d0] sm:$0xff]  }
 0x339   :  { %5282 = vmatprep.subr.bf16.mxu0 %v5933_v51  ;;  %v5962_v51 = vld [vmem:[%s8292_s5 + $0x300] sm:$0xff]  }
 0x33a   :  { %5305 = vmatpush3.bf16.msra.mxu1 %v5932_v13  ;;  %v1237_v13 = vpack.c.bf16 %v7208_v1, %v7208_v1  ;;  %v5969_v1 = vld [vmem:[%s8292_s5 + $0x350] sm:$0xff]  }
 0x33b   :  { %5306 = vmatprep.subr.bf16.mxu1 %v5935_v17  ;;  %v5966_v17 = vld [vmem:[%s8292_s5 + $0x308] sm:$0xff]  }
 0x33c   :  { %5283 = vmatpush3.bf16.msra.mxu0 %v5934_v31  ;;  %v5968_v31 = vld [vmem:[%s8292_s5 + $0x390] sm:$0xff]  }
 0x33d   :  { %5284 = vmatprep.subr.bf16.mxu0 %v5937_v18  ;;  %v5971_v18 = vld [vmem:[%s8292_s5 + $0x3d8] sm:$0xff]  }
 0x33e   :  { %5307 = vmatpush3.bf16.msra.mxu1 %v5936_v40  ;;  %v5970_v40 = vld [vmem:[%s8292_s5 + $0x310] sm:$0xff]  }
 0x33f   :  { %5308 = vmatprep.subr.bf16.mxu1 %v5939_v44  ;;  %v5973_v44 = vld [vmem:[%s8292_s5 + $0x358] sm:$0xff]  }
 0x340   :  { %5285 = vmatpush3.bf16.msra.mxu0 %v5938_v62  ;;  %v5972_v62 = vld [vmem:[%s8292_s5 + $0x398] sm:$0xff]  }
 0x341   :  { %5286 = vmatprep.subr.bf16.mxu0 %v5941_v2  ;;  %v5975_v2 = vld [vmem:[%s8292_s5 + $0x3e0] sm:$0xff]  }
 0x342   :  { %5309 = vmatpush3.bf16.msra.mxu1 %v5940_v22  ;;  %v5974_v22 = vld [vmem:[%s8292_s5 + $0x318] sm:$0xff]  }
 0x343   :  { %5310 = vmatprep.subr.bf16.mxu1 %v5943_v12  ;;  %v5977_v12 = vld [vmem:[%s8292_s5 + $0x360] sm:$0xff]  }
 0x344   :  { %5287 = vmatpush3.bf16.msra.mxu0 %v5942_v7  ;;  %v5976_v7 = vld [vmem:[%s8292_s5 + $0x3a0] sm:$0xff]  }
 0x345   :  { %5288 = vmatprep.subr.bf16.mxu0 %v5945_v37  ;;  %v5979_v37 = vld [vmem:[%s8292_s5 + $0x3e8] sm:$0xff]  }
 0x346   :  { %5311 = vmatpush3.bf16.msra.mxu1 %v5944_v21  ;;  %v5978_v21 = vld [vmem:[%s8292_s5 + $0x320] sm:$0xff]  }
 0x347   :  { %5312 = vmatprep.subr.bf16.mxu1 %v5947_v41  ;;  %v5981_v41 = vld [vmem:[%s8292_s5 + $0x368] sm:$0xff]  }
 0x348   :  { %5289 = vmatpush3.bf16.msra.mxu0 %v5946_v63  ;;  %v5980_v63 = vld [vmem:[%s8292_s5 + $0x3a8] sm:$0xff]  }
 0x349   :  { %5290 = vmatprep.subr.bf16.mxu0 %v5949_v57  ;;  %v5983_v57 = vld [vmem:[%s8292_s5 + $0x3f0] sm:$0xff]  }
 0x34a   :  { %5313 = vmatpush3.bf16.msra.mxu1 %v5948_v52  ;;  %v5982_v52 = vld [vmem:[%s8292_s5 + $0x328] sm:$0xff]  }
 0x34b   :  { %5314 = vmatprep.subr.bf16.mxu1 %v5951_v16  ;;  %v5985_v16 = vld [vmem:[%s8292_s5 + $0x370] sm:$0xff]  }
 0x34c   :  { %5291 = vmatpush3.bf16.msra.mxu0 %v5950_v3  ;;  %v5984_v3 = vld [vmem:[%s8292_s5 + $0x3b0] sm:$0xff]  }
 0x34d   :  { %5292 = vmatprep.subr.bf16.mxu0 %v5953_v45  ;;  %v5987_v45 = vld [vmem:[%s8292_s5 + $0x3f8] sm:$0xff]  }
 0x34e   :  { %5315 = vmatpush3.bf16.msra.mxu1 %v5952_v23  ;;  %v5986_v23 = vld [vmem:[%s8292_s5 + $0x330] sm:$0xff]  }
 0x34f   :  { %5316 = vmatprep.subr.bf16.mxu1 %v5955_v14  ;;  %v5989_v14 = vld [vmem:[%s8292_s5 + $0x378] sm:$0xff]  }
 0x350   :  { %5293 = vmatpush3.bf16.msra.mxu0 %v5954_v53  ;;  %v5988_v53 = vld [vmem:[%s8292_s5 + $0x3b8] sm:$0xff]  }
 0x351   :  { %5294 = vmatprep.subr.bf16.mxu0 %v5957_v36  ;;  %v5991_v36 = vld [vmem:[%s8292_s5 + $0x4c0] sm:$0xff]  }
 0x352   :  { %5317 = vmatpush3.bf16.msra.mxu1 %v5956_v60  ;;  %v5990_v60 = vld [vmem:[%s8292_s5 + $0x338] sm:$0xff]  }
 0x353   :  { %5346 = vmatprep.subr.bf16.mxu1 %v5959_v56  ;;  %v5993_v56 = vld [vmem:[%s8292_s5 + $0x440] sm:$0xff]  }
 0x354   :  { %5295 = vmatpush3.bf16.msra.mxu0 %v5958_v5  ;;  %v5992_v5 = vld [vmem:[%s8292_s5 + $0x480] sm:$0xff]  }
 0x355   :  { %4064 = vmatmul.mubr.bf16.vlgmr.msra.gmra.mrb[28].mxu1 %v1234_v58  ;;  %5324 = vmatprep.subr.bf16.mxu0 %v5961_v46  ;;  %v1238_v46 = vpack.c.bf16 %v7224_v30, %v7224_v30  ;;  %v1243_v58 = vpack.c.bf16 %v7214_v15, %v7214_v15  ;;  %v5997_v30 = vld [vmem:[%s8292_s5 + $0x448] sm:$0xff]  }
 0x356   :  { %5347 = vmatpush3.bf16.msra.mxu1 %v5960_v0  ;;  %4143 = vmatprep.mubr.bf16.mxu1 %v1239_v43  ;;  %v5995_v0 = vld [vmem:[%s8292_s5 + $0x4c8] sm:$0xff]   ;;  %v1236_v43 = vpack.c.bf16 %v7238_v59, %v7238_v59  ;;  %v5999_v59 = vld [vmem:[%s8292_s5 + $0x4d0] sm:$0xff]  }
 0x357   :  { %4024 = vmatmul.mubr.bf16.vlgmr.msra.gmra.mrb[24].mxu0 %v1232_v26  ;;  %5348 = vmatprep.subr.bf16.mxu1 %v5963_v47  ;;  %v5994_v47 = vld [vmem:[%s8292_s5 + $0x400] sm:$0xff]   ;;  %v5996_v15 = vld [vmem:[%s8292_s5 + $0x488] sm:$0xff]  }
 0x358   :  { %5325 = vmatpush3.bf16.msra.mxu0 %v5962_v51  ;;  %4103 = vmatprep.mubr.bf16.mxu0 %v1237_v13  ;;  %v1241_v51 = vpack.c.bf16 %v7242_v28, %v7242_v28  ;;  %v5998_v26 = vld [vmem:[%s8292_s5 + $0x408] sm:$0xff]   ;;  %v6001_v28 = vld [vmem:[%s8292_s5 + $0x450] sm:$0xff]   ;;  %v6003_v13 = vld [vmem:[%s8292_s5 + $0x4d8] sm:$0xff]  }
 0x359   :  { %5326 = vmatprep.subr.bf16.mxu0 %v5965_v20  ;;  %v6000_v20 = vld [vmem:[%s8292_s5 + $0x490] sm:$0xff]  }
 0x35a   :  { %5349 = vmatpush3.bf16.msra.mxu1 %v5964_v50  ;;  %v6002_v50 = vld [vmem:[%s8292_s5 + $0x410] sm:$0xff]  }
 0x35b   :  { %5350 = vmatprep.subr.bf16.mxu1 %v5967_v34  ;;  %v6005_v34 = vld [vmem:[%s8292_s5 + $0x458] sm:$0xff]  }
 0x35c   :  { %5327 = vmatpush3.bf16.msra.mxu0 %v5966_v17  ;;  %v6004_v17 = vld [vmem:[%s8292_s5 + $0x498] sm:$0xff]  }
 0x35d   :  { %5328 = vmatprep.subr.bf16.mxu0 %v5969_v1  ;;  %v6007_v1 = vld [vmem:[%s8292_s5 + $0x4e0] sm:$0xff]  }
 0x35e   :  { %5351 = vmatpush3.bf16.msra.mxu1 %v5968_v31  ;;  %v6006_v31 = vld [vmem:[%s8292_s5 + $0x418] sm:$0xff]  }
 0x35f   :  { %5352 = vmatprep.subr.bf16.mxu1 %v5971_v18  ;;  %v6009_v18 = vld [vmem:[%s8292_s5 + $0x460] sm:$0xff]  }
 0x360   :  { %5329 = vmatpush3.bf16.msra.mxu0 %v5970_v40  ;;  %v6008_v40 = vld [vmem:[%s8292_s5 + $0x4a0] sm:$0xff]  }
 0x361   :  { %5330 = vmatprep.subr.bf16.mxu0 %v5973_v44  ;;  %v6011_v44 = vld [vmem:[%s8292_s5 + $0x4e8] sm:$0xff]  }
 0x362   :  { %5353 = vmatpush3.bf16.msra.mxu1 %v5972_v62  ;;  %v6010_v62 = vld [vmem:[%s8292_s5 + $0x420] sm:$0xff]  }
 0x363   :  { %5354 = vmatprep.subr.bf16.mxu1 %v5975_v2  ;;  %v6013_v2 = vld [vmem:[%s8292_s5 + $0x468] sm:$0xff]  }
 0x364   :  { %5331 = vmatpush3.bf16.msra.mxu0 %v5974_v22  ;;  %v6012_v22 = vld [vmem:[%s8292_s5 + $0x4a8] sm:$0xff]  }
 0x365   :  { %5332 = vmatprep.subr.bf16.mxu0 %v5977_v12  ;;  %v6015_v12 = vld [vmem:[%s8292_s5 + $0x4f0] sm:$0xff]  }
 0x366   :  { %5355 = vmatpush3.bf16.msra.mxu1 %v5976_v7  ;;  %v6014_v7 = vld [vmem:[%s8292_s5 + $0x428] sm:$0xff]  }
 0x367   :  { %5356 = vmatprep.subr.bf16.mxu1 %v5979_v37  ;;  %v6017_v37 = vld [vmem:[%s8292_s5 + $0x470] sm:$0xff]  }
 0x368   :  { %5333 = vmatpush3.bf16.msra.mxu0 %v5978_v21  ;;  %v6016_v21 = vld [vmem:[%s8292_s5 + $0x4b0] sm:$0xff]  }
 0x369   :  { %5334 = vmatprep.subr.bf16.mxu0 %v5981_v41  ;;  %v6019_v41 = vld [vmem:[%s8292_s5 + $0x4f8] sm:$0xff]  }
 0x36a   :  { %5357 = vmatpush3.bf16.msra.mxu1 %v5980_v63  ;;  %v6018_v63 = vld [vmem:[%s8292_s5 + $0x430] sm:$0xff]  }
 0x36b   :  { %5358 = vmatprep.subr.bf16.mxu1 %v5983_v57  ;;  %v6021_v57 = vld [vmem:[%s8292_s5 + $0x478] sm:$0xff]  }
 0x36c   :  { %5335 = vmatpush3.bf16.msra.mxu0 %v5982_v52  ;;  %v6020_v52 = vld [vmem:[%s8292_s5 + $0x4b8] sm:$0xff]  }
 0x36d   :  { %5336 = vmatprep.subr.bf16.mxu0 %v5985_v16  ;;  %v6023_v16 = vld [vmem:[%s8292_s5 + $0x5c0] sm:$0xff]  }
 0x36e   :  { %5359 = vmatpush3.bf16.msra.mxu1 %v5984_v3  ;;  %v6022_v3 = vld [vmem:[%s8292_s5 + $0x438] sm:$0xff]  }
 0x36f   :  { %5360 = vmatprep.subr.bf16.mxu1 %v5987_v45  ;;  %v6025_v45 = vld [vmem:[%s8292_s5 + $0x540] sm:$0xff]  }
 0x370   :  { %5337 = vmatpush3.bf16.msra.mxu0 %v5986_v23  ;;  %v6024_v23 = vld [vmem:[%s8292_s5 + $0x580] sm:$0xff]  }
 0x371   :  { %5338 = vmatprep.subr.bf16.mxu0 %v5989_v14  ;;  %v1242_v14 = vpack.c.bf16 %v7228_v33, %v7228_v33  ;;  %v6029_v33 = vld [vmem:[%s8292_s5 + $0x548] sm:$0xff]  }
 0x372   :  { %5361 = vmatpush3.bf16.msra.mxu1 %v5988_v53  ;;  %v6027_v53 = vld [vmem:[%s8292_s5 + $0x5c8] sm:$0xff]  }
 0x373   :  { %5390 = vmatprep.subr.bf16.mxu1 %v5991_v36  ;;  %v1247_v36 = vpack.c.bf16 %v7265_v48, %v7265_v48  ;;  %v6028_v48 = vld [vmem:[%s8292_s5 + $0x588] sm:$0xff]  }
 0x374   :  { %5339 = vmatpush3.bf16.msra.mxu0 %v5990_v60  ;;  %v6026_v60 = vld [vmem:[%s8292_s5 + $0x500] sm:$0xff]  }
 0x375   :  { %4144 = vmatmul.mubr.bf16.vlgmr.msra.gmra.mrb[32].mxu1 %v1238_v46  ;;  %5368 = vmatprep.subr.bf16.mxu0 %v5993_v56  ;;  %v1240_v56 = vpack.c.bf16 %v7269_v4, %v7269_v4  ;;  %v6031_v4 = vld [vmem:[%s8292_s5 + $0x5d0] sm:$0xff]   ;;  %v6030_v46 = vld [vmem:[%s8292_s5 + $0x508] sm:$0xff]  }
 0x376   :  { %5391 = vmatpush3.bf16.msra.mxu1 %v5992_v5  ;;  %4223 = vmatprep.mubr.bf16.mxu1 %v1243_v58  ;;  %v1245_v5 = vpack.c.bf16 %v7279_v35, %v7279_v35  ;;  %v6033_v35 = vld [vmem:[%s8292_s5 + $0x550] sm:$0xff]   ;;  %v6035_v58 = vld [vmem:[%s8292_s5 + $0x5d8] sm:$0xff]  }
 0x377   :  { %4104 = vmatmul.mubr.bf16.vlgmr.msra.gmra.mrb[28].mxu0 %v1236_v43  ;;  %5392 = vmatprep.subr.bf16.mxu1 %v5995_v0  ;;  %v6032_v0 = vld [vmem:[%s8292_s5 + $0x590] sm:$0xff]   ;;  %v6037_v43 = vld [vmem:[%s8292_s5 + $0x558] sm:$0xff]  }
 0x378   :  { %5369 = vmatpush3.bf16.msra.mxu0 %v5994_v47  ;;  %4183 = vmatprep.mubr.bf16.mxu0 %v1241_v51  ;;  %v6034_v47 = vld [vmem:[%s8292_s5 + $0x510] sm:$0xff]   ;;  %v6039_v51 = vld [vmem:[%s8292_s5 + $0x5e0] sm:$0xff]  }
 0x379   :  { %5370 = vmatprep.subr.bf16.mxu0 %v5997_v30  ;;  %v6036_v30 = vld [vmem:[%s8292_s5 + $0x598] sm:$0xff]  }
 0x37a   :  { %5393 = vmatpush3.bf16.msra.mxu1 %v5996_v15  ;;  %v6038_v15 = vld [vmem:[%s8292_s5 + $0x518] sm:$0xff]  }
 0x37b   :  { %5394 = vmatprep.subr.bf16.mxu1 %v5999_v59  ;;  %v6041_v59 = vld [vmem:[%s8292_s5 + $0x560] sm:$0xff]  }
 0x37c   :  { %5371 = vmatpush3.bf16.msra.mxu0 %v5998_v26  ;;  %v6040_v26 = vld [vmem:[%s8292_s5 + $0x5a0] sm:$0xff]  }
 0x37d   :  { %5372 = vmatprep.subr.bf16.mxu0 %v6001_v28  ;;  %v6043_v28 = vld [vmem:[%s8292_s5 + $0x5e8] sm:$0xff]  }
 0x37e   :  { %5395 = vmatpush3.bf16.msra.mxu1 %v6000_v20  ;;  %v6042_v20 = vld [vmem:[%s8292_s5 + $0x520] sm:$0xff]  }
 0x37f   :  { %5396 = vmatprep.subr.bf16.mxu1 %v6003_v13  ;;  %v6045_v13 = vld [vmem:[%s8292_s5 + $0x568] sm:$0xff]  }
 0x380   :  { %5373 = vmatpush3.bf16.msra.mxu0 %v6002_v50  ;;  %v6044_v50 = vld [vmem:[%s8292_s5 + $0x5a8] sm:$0xff]  }
 0x381   :  { %5374 = vmatprep.subr.bf16.mxu0 %v6005_v34  ;;  %v6047_v34 = vld [vmem:[%s8292_s5 + $0x5f0] sm:$0xff]  }
 0x382   :  { %5397 = vmatpush3.bf16.msra.mxu1 %v6004_v17  ;;  %v6046_v17 = vld [vmem:[%s8292_s5 + $0x528] sm:$0xff]  }
 0x383   :  { %5398 = vmatprep.subr.bf16.mxu1 %v6007_v1  ;;  %v6049_v1 = vld [vmem:[%s8292_s5 + $0x570] sm:$0xff]  }
 0x384   :  { %5375 = vmatpush3.bf16.msra.mxu0 %v6006_v31  ;;  %v6048_v31 = vld [vmem:[%s8292_s5 + $0x5b0] sm:$0xff]  }
 0x385   :  { %5376 = vmatprep.subr.bf16.mxu0 %v6009_v18  ;;  %v6051_v18 = vld [vmem:[%s8292_s5 + $0x5f8] sm:$0xff]  }
 0x386   :  { %5399 = vmatpush3.bf16.msra.mxu1 %v6008_v40  ;;  %v6050_v40 = vld [vmem:[%s8292_s5 + $0x530] sm:$0xff]  }
 0x387   :  { %5400 = vmatprep.subr.bf16.mxu1 %v6011_v44  ;;  %v6053_v44 = vld [vmem:[%s8292_s5 + $0x578] sm:$0xff]  }
 0x388   :  { %5377 = vmatpush3.bf16.msra.mxu0 %v6010_v62  ;;  %v6052_v62 = vld [vmem:[%s8292_s5 + $0x5b8] sm:$0xff]  }
 0x389   :  { %5378 = vmatprep.subr.bf16.mxu0 %v6013_v2  ;;  %v6055_v2 = vld [vmem:[%s8292_s5 + $0x6c0] sm:$0xff]  }
 0x38a   :  { %5401 = vmatpush3.bf16.msra.mxu1 %v6012_v22  ;;  %v6054_v22 = vld [vmem:[%s8292_s5 + $0x538] sm:$0xff]  }
 0x38b   :  { %5402 = vmatprep.subr.bf16.mxu1 %v6015_v12  ;;  %v6057_v12 = vld [vmem:[%s8292_s5 + $0x640] sm:$0xff]  }
 0x38c   :  { %5379 = vmatpush3.bf16.msra.mxu0 %v6014_v7  ;;  %v6056_v7 = vld [vmem:[%s8292_s5 + $0x680] sm:$0xff]  }
 0x38d   :  { %5380 = vmatprep.subr.bf16.mxu0 %v6017_v37  ;;  %v1246_v37 = vpack.c.bf16 %v7282_v24, %v7282_v24  ;;  %v6061_v24 = vld [vmem:[%s8292_s5 + $0x648] sm:$0xff]  }
 0x38e   :  { %5403 = vmatpush3.bf16.msra.mxu1 %v6016_v21  ;;  %v6059_v21 = vld [vmem:[%s8292_s5 + $0x6c8] sm:$0xff]  }
 0x38f   :  { %5404 = vmatprep.subr.bf16.mxu1 %v6019_v41  ;;  %v1251_v41 = vpack.c.bf16 %v7289_v8, %v7289_v8  ;;  %v6060_v8 = vld [vmem:[%s8292_s5 + $0x688] sm:$0xff]  }
 0x390   :  { %5381 = vmatpush3.bf16.msra.mxu0 %v6018_v63  ;;  %v6058_v63 = vld [vmem:[%s8292_s5 + $0x600] sm:$0xff]  }
 0x391   :  { %5382 = vmatprep.subr.bf16.mxu0 %v6021_v57  ;;  %v1244_v57 = vpack.c.bf16 %v7292_v11, %v7292_v11  ;;  %v6063_v11 = vld [vmem:[%s8292_s5 + $0x6d0] sm:$0xff]  }
 0x392   :  { %5405 = vmatpush3.bf16.msra.mxu1 %v6020_v52  ;;  %v1249_v52 = vpack.c.bf16 %v7300_v6, %v7300_v6  ;;  %v6065_v6 = vld [vmem:[%s8292_s5 + $0x650] sm:$0xff]  }
 0x393   :  { %5434 = vmatprep.subr.bf16.mxu1 %v6023_v16  ;;  %v6062_v16 = vld [vmem:[%s8292_s5 + $0x608] sm:$0xff]  }
 0x394   :  { %5383 = vmatpush3.bf16.msra.mxu0 %v6022_v3  ;;  %v6064_v3 = vld [vmem:[%s8292_s5 + $0x690] sm:$0xff]  }
 0x395   :  { %4224 = vmatmul.mubr.bf16.vlgmr.msra.gmra.mrb[36].mxu1 %v1242_v14  ;;  %5412 = vmatprep.subr.bf16.mxu0 %v6025_v45  ;;  %v6067_v45 = vld [vmem:[%s8292_s5 + $0x6d8] sm:$0xff]  }
 0x396   :  { %5435 = vmatpush3.bf16.msra.mxu1 %v6024_v23  ;;  %4303 = vmatprep.mubr.bf16.mxu1 %v1247_v36  ;;  %v6066_v23 = vld [vmem:[%s8292_s5 + $0x610] sm:$0xff]   ;;  %v6069_v14 = vld [vmem:[%s8292_s5 + $0x658] sm:$0xff]   ;;  %v6071_v36 = vld [vmem:[%s8292_s5 + $0x6e0] sm:$0xff]  }
 0x397   :  { %4184 = vmatmul.mubr.bf16.vlgmr.msra.gmra.mrb[32].mxu0 %v1240_v56  ;;  %5436 = vmatprep.subr.bf16.mxu1 %v6027_v53  ;;  %v6068_v53 = vld [vmem:[%s8292_s5 + $0x698] sm:$0xff]   ;;  %v6073_v56 = vld [vmem:[%s8292_s5 + $0x660] sm:$0xff]  }
 0x398   :  { %5413 = vmatpush3.bf16.msra.mxu0 %v6026_v60  ;;  %4263 = vmatprep.mubr.bf16.mxu0 %v1245_v5  ;;  %v6070_v60 = vld [vmem:[%s8292_s5 + $0x618] sm:$0xff]   ;;  %v6075_v5 = vld [vmem:[%s8292_s5 + $0x6e8] sm:$0xff]  }
 0x399   :  { %5414 = vmatprep.subr.bf16.mxu0 %v6029_v33  ;;  %v6072_v33 = vld [vmem:[%s8292_s5 + $0x6a0] sm:$0xff]  }
 0x39a   :  { %5437 = vmatpush3.bf16.msra.mxu1 %v6028_v48  ;;  %v6074_v48 = vld [vmem:[%s8292_s5 + $0x620] sm:$0xff]  }
 0x39b   :  { %5438 = vmatprep.subr.bf16.mxu1 %v6031_v4  ;;  %v6077_v4 = vld [vmem:[%s8292_s5 + $0x668] sm:$0xff]  }
 0x39c   :  { %5415 = vmatpush3.bf16.msra.mxu0 %v6030_v46  ;;  %v6076_v46 = vld [vmem:[%s8292_s5 + $0x6a8] sm:$0xff]  }
 0x39d   :  { %5416 = vmatprep.subr.bf16.mxu0 %v6033_v35  ;;  %v6079_v35 = vld [vmem:[%s8292_s5 + $0x6f0] sm:$0xff]  }
 0x39e   :  { %5439 = vmatpush3.bf16.msra.mxu1 %v6032_v0  ;;  %v6078_v0 = vld [vmem:[%s8292_s5 + $0x628] sm:$0xff]  }
 0x39f   :  { %5440 = vmatprep.subr.bf16.mxu1 %v6035_v58  ;;  %v6081_v58 = vld [vmem:[%s8292_s5 + $0x670] sm:$0xff]  }
 0x3a0   :  { %5417 = vmatpush3.bf16.msra.mxu0 %v6034_v47  ;;  %v6080_v47 = vld [vmem:[%s8292_s5 + $0x6b0] sm:$0xff]  }
 0x3a1   :  { %5418 = vmatprep.subr.bf16.mxu0 %v6037_v43  ;;  %v6083_v43 = vld [vmem:[%s8292_s5 + $0x6f8] sm:$0xff]  }
 0x3a2   :  { %5441 = vmatpush3.bf16.msra.mxu1 %v6036_v30  ;;  %v6082_v30 = vld [vmem:[%s8292_s5 + $0x630] sm:$0xff]  }
 0x3a3   :  { %5442 = vmatprep.subr.bf16.mxu1 %v6039_v51  ;;  %v6085_v51 = vld [vmem:[%s8292_s5 + $0x678] sm:$0xff]  }
 0x3a4   :  { %5419 = vmatpush3.bf16.msra.mxu0 %v6038_v15  ;;  %v6084_v15 = vld [vmem:[%s8292_s5 + $0x6b8] sm:$0xff]  }
 0x3a5   :  { %5420 = vmatprep.subr.bf16.mxu0 %v6041_v59  ;;  %v6087_v59 = vld [vmem:[%s8292_s5 + $0x7c0] sm:$0xff]  }
 0x3a6   :  { %5443 = vmatpush3.bf16.msra.mxu1 %v6040_v26  ;;  %v6086_v26 = vld [vmem:[%s8292_s5 + $0x638] sm:$0xff]  }
 0x3a7   :  { %5444 = vmatprep.subr.bf16.mxu1 %v6043_v28  ;;  %v6089_v28 = vld [vmem:[%s8292_s5 + $0x740] sm:$0xff]  }
 0x3a8   :  { %5421 = vmatpush3.bf16.msra.mxu0 %v6042_v20  ;;  %v6088_v20 = vld [vmem:[%s8292_s5 + $0x780] sm:$0xff]  }
 0x3a9   :  { %5422 = vmatprep.subr.bf16.mxu0 %v6045_v13  ;;  %v1250_v13 = vpack.c.bf16 %v7303_v49, %v7303_v49  ;;  %v6093_v49 = vld [vmem:[%s8292_s5 + $0x748] sm:$0xff]  }
 0x3aa   :  { %5445 = vmatpush3.bf16.msra.mxu1 %v6044_v50  ;;  %v6091_v50 = vld [vmem:[%s8292_s5 + $0x7c8] sm:$0xff]  }
 0x3ab   :  { %5446 = vmatprep.subr.bf16.mxu1 %v6047_v34  ;;  %v1255_v34 = vpack.c.bf16 %v7327_v42, %v7327_v42  ;;  %v6092_v42 = vld [vmem:[%s8292_s5 + $0x788] sm:$0xff]  }
 0x3ac   :  { %5423 = vmatpush3.bf16.msra.mxu0 %v6046_v17  ;;  %v6090_v17 = vld [vmem:[%s8292_s5 + $0x700] sm:$0xff]  }
 0x3ad   :  { %5424 = vmatprep.subr.bf16.mxu0 %v6049_v1  ;;  %v1248_v1 = vpack.c.bf16 %v7330_v29, %v7330_v29  ;;  %v6095_v29 = vld [vmem:[%s8292_s5 + $0x7d0] sm:$0xff]  }
 0x3ae   :  { %5447 = vmatpush3.bf16.msra.mxu1 %v6048_v31  ;;  %v1253_v31 = vpack.c.bf16 %v7338_v32, %v7338_v32  ;;  %v6097_v32 = vld [vmem:[%s8292_s5 + $0x750] sm:$0xff]  }
 0x3af   :  { %5448 = vmatprep.subr.bf16.mxu1 %v6051_v18  ;;  %v6094_v18 = vld [vmem:[%s8292_s5 + $0x708] sm:$0xff]  }
 0x3b0   :  { %5425 = vmatpush3.bf16.msra.mxu0 %v6050_v40  ;;  %v6096_v40 = vld [vmem:[%s8292_s5 + $0x790] sm:$0xff]  }
 0x3b1   :  { %5426 = vmatprep.subr.bf16.mxu0 %v6053_v44  ;;  %v6099_v44 = vld [vmem:[%s8292_s5 + $0x7d8] sm:$0xff]  }
 0x3b2   :  { %5449 = vmatpush3.bf16.msra.mxu1 %v6052_v62  ;;  %v6098_v62 = vld [vmem:[%s8292_s5 + $0x710] sm:$0xff]  }
 0x3b3   :  { %5478 = vmatprep.subr.bf16.mxu1 %v6055_v2  ;;  %v6101_v2 = vld [vmem:[%s8292_s5 + $0x758] sm:$0xff]  }
 0x3b4   :  { %5427 = vmatpush3.bf16.msra.mxu0 %v6054_v22  ;;  %v6100_v22 = vld [vmem:[%s8292_s5 + $0x798] sm:$0xff]  }
 0x3b5   :  { %4304 = vmatmul.mubr.bf16.vlgmr.msra.gmra.mrb[40].mxu1 %v1246_v37  ;;  %5456 = vmatprep.subr.bf16.mxu0 %v6057_v12  ;;  %v6103_v12 = vld [vmem:[%s8292_s5 + $0x7e0] sm:$0xff]  }
 0x3b6   :  { %5479 = vmatpush3.bf16.msra.mxu1 %v6056_v7  ;;  %4383 = vmatprep.mubr.bf16.mxu1 %v1251_v41  ;;  %v6102_v7 = vld [vmem:[%s8292_s5 + $0x718] sm:$0xff]   ;;  %v6105_v37 = vld [vmem:[%s8292_s5 + $0x760] sm:$0xff]   ;;  %v6107_v41 = vld [vmem:[%s8292_s5 + $0x7e8] sm:$0xff]  }
 0x3b7   :  { %4264 = vmatmul.mubr.bf16.vlgmr.msra.gmra.mrb[36].mxu0 %v1244_v57  ;;  %5480 = vmatprep.subr.bf16.mxu1 %v6059_v21  ;;  %v6104_v21 = vld [vmem:[%s8292_s5 + $0x7a0] sm:$0xff]   ;;  %v6109_v57 = vld [vmem:[%s8292_s5 + $0x768] sm:$0xff]  }
 0x3b8   :  { %5457 = vmatpush3.bf16.msra.mxu0 %v6058_v63  ;;  %4343 = vmatprep.mubr.bf16.mxu0 %v1249_v52  ;;  %v6106_v63 = vld [vmem:[%s8292_s5 + $0x720] sm:$0xff]   ;;  %v6111_v52 = vld [vmem:[%s8292_s5 + $0x7f0] sm:$0xff]  }
 0x3b9   :  { %5458 = vmatprep.subr.bf16.mxu0 %v6061_v24  ;;  %v6108_v24 = vld [vmem:[%s8292_s5 + $0x7a8] sm:$0xff]  }
 0x3ba   :  { %5481 = vmatpush3.bf16.msra.mxu1 %v6060_v8 }
 0x3bb   :  { %5482 = vmatprep.subr.bf16.mxu1 %v6063_v11  ;;  %v6110_v11 = vld [vmem:[%s8292_s5 + $0x728] sm:$0xff]  }
 0x3bc   :  { %5459 = vmatpush3.bf16.msra.mxu0 %v6062_v16 }
 0x3bd   :  { %5460 = vmatprep.subr.bf16.mxu0 %v6065_v6  ;;  %v6113_v6 = vld [vmem:[%s8292_s5 + $0x770] sm:$0xff]  }
 0x3be   :  { %5483 = vmatpush3.bf16.msra.mxu1 %v6064_v3 }
 0x3bf   :  { %5484 = vmatprep.subr.bf16.mxu1 %v6067_v45 }
 0x3c0   :  { %5461 = vmatpush3.bf16.msra.mxu0 %v6066_v23 }
 0x3c1   :  { %5462 = vmatprep.subr.bf16.mxu0 %v6069_v14  ;;  %v6112_v14 = vld [vmem:[%s8292_s5 + $0x7b0] sm:$0xff]  }
 0x3c2   :  { %5485 = vmatpush3.bf16.msra.mxu1 %v6068_v53  ;;  %v4861_v53 = vld [vmem:[%s8293_s6] ss:$0 sm:$0xff] }
 0x3c3   :  { %5486 = vmatprep.subr.bf16.mxu1 %v6071_v36 }
 0x3c4   :  { %5463 = vmatpush3.bf16.msra.mxu0 %v6070_v60 }
 0x3c5   :  { %5464 = vmatprep.subr.bf16.mxu0 %v6073_v56  ;;  %v6115_v56 = vld [vmem:[%s8292_s5 + $0x7f8] sm:$0xff]  }
 0x3c6   :  { %5487 = vmatpush3.bf16.msra.mxu1 %v6072_v33 }
 0x3c7   :  { %5488 = vmatprep.subr.bf16.mxu1 %v6075_v5 }
 0x3c8   :  { %5465 = vmatpush3.bf16.msra.mxu0 %v6074_v48  ;;  %v6114_v48 = vld [vmem:[%s8292_s5 + $0x730] sm:$0xff]  }
 0x3c9   :  { %5466 = vmatprep.subr.bf16.mxu0 %v6077_v4 }
 0x3ca   :  { %5489 = vmatpush3.bf16.msra.mxu1 %v6076_v46  ;;  %v6117_v46 = vld [vmem:[%s8292_s5 + $0x778] sm:$0xff]  }
 0x3cb   :  { %5490 = vmatprep.subr.bf16.mxu1 %v6079_v35 }
 0x3cc   :  { %5467 = vmatpush3.bf16.msra.mxu0 %v6078_v0  ;;  %v6116_v0 = vld [vmem:[%s8292_s5 + $0x7b8] sm:$0xff]  }
 0x3cd   :  { %5468 = vmatprep.subr.bf16.mxu0 %v6081_v58  ;;  %v6119_v58 = vld [vmem:[%s8292_s5 + $0x8c0] sm:$0xff]  }
 0x3ce   :  { %5491 = vmatpush3.bf16.msra.mxu1 %v6080_v47  ;;  %v6118_v47 = vld [vmem:[%s8292_s5 + $0x738] sm:$0xff]  }
 0x3cf   :  { %5492 = vmatprep.subr.bf16.mxu1 %v6083_v43 }
 0x3d0   :  { %5469 = vmatpush3.bf16.msra.mxu0 %v6082_v30  ;;  %v6121_v30 = vld [vmem:[%s8292_s5 + $0x840] sm:$0xff]  }
 0x3d1   :  { %5470 = vmatprep.subr.bf16.mxu0 %v6085_v51  ;;  %v6120_v51 = vld [vmem:[%s8292_s5 + $0x880] sm:$0xff]  }
 0x3d2   :  { %5493 = vmatpush3.bf16.msra.mxu1 %v6084_v15  ;;  %v1254_v15 = vpack.c.bf16 %v7341_v61, %v7341_v61  ;;  %v6125_v61 = vld [vmem:[%s8292_s5 + $0x848] sm:$0xff]  }
 0x3d3   :  { %5522 = vmatprep.subr.bf16.mxu1 %v6087_v59  ;;  %v6123_v59 = vld [vmem:[%s8292_s5 + $0x8c8] sm:$0xff]  }
 0x3d4   :  { %5471 = vmatpush3.bf16.msra.mxu0 %v6086_v26  ;;  %v1259_v26 = vpack.c.bf16 %v7319_v38, %v7319_v38  ;;  %v6124_v38 = vld [vmem:[%s8292_s5 + $0x888] sm:$0xff]  }
 0x3d5   :  { %4384 = vmatmul.mubr.bf16.vlgmr.msra.gmra.mrb[44].mxu1 %v1250_v13  ;;  %5500 = vmatprep.subr.bf16.mxu0 %v6089_v28  ;;  %v6122_v28 = vld [vmem:[%s8292_s5 + $0x800] sm:$0xff]   ;;  %v1257_v13 = vpack.c.bf16 %v7352_v54, %v7352_v54  ;;  %v6129_v54 = vld [vmem:[%s8292_s5 + $0x850] sm:$0xff]  }
 0x3d6   :  { %5523 = vmatpush3.bf16.msra.mxu1 %v6088_v20  ;;  %4463 = vmatprep.mubr.bf16.mxu1 %v1255_v34  ;;  %v1252_v20 = vpack.c.bf16 %v7348_v55, %v7348_v55  ;;  %v6127_v55 = vld [vmem:[%s8292_s5 + $0x8d0] sm:$0xff]  }
 0x3d7   :  { %4344 = vmatmul.mubr.bf16.vlgmr.msra.gmra.mrb[40].mxu0 %v1248_v1  ;;  %5524 = vmatprep.subr.bf16.mxu1 %v6091_v50  ;;  %v6126_v50 = vld [vmem:[%s8292_s5 + $0x808] sm:$0xff]   ;;  %v6128_v34 = vld [vmem:[%s8292_s5 + $0x890] sm:$0xff]  }
 0x3d8   :  { %5501 = vmatpush3.bf16.msra.mxu0 %v6090_v17  ;;  %4423 = vmatprep.mubr.bf16.mxu0 %v1253_v31  ;;  %v6131_v17 = vld [vmem:[%s8292_s5 + $0x8d8] sm:$0xff]   ;;  %v6130_v1 = vld [vmem:[%s8292_s5 + $0x810] sm:$0xff]  }
 0x3d9   :  { %5502 = vmatprep.subr.bf16.mxu0 %v6093_v49  ;;  %v6133_v49 = vld [vmem:[%s8292_s5 + $0x858] sm:$0xff]  }
 0x3da   :  { %5525 = vmatpush3.bf16.msra.mxu1 %v6092_v42  ;;  %v6132_v31 = vld [vmem:[%s8292_s5 + $0x898] sm:$0xff]   ;;  %v6135_v42 = vld [vmem:[%s8292_s5 + $0x8e0] sm:$0xff]  }
 0x3db   :  { %5526 = vmatprep.subr.bf16.mxu1 %v6095_v29  ;;  %v6134_v29 = vld [vmem:[%s8292_s5 + $0x818] sm:$0xff]  }
 0x3dc   :  { %5503 = vmatpush3.bf16.msra.mxu0 %v6094_v18  ;;  %v6137_v18 = vld [vmem:[%s8292_s5 + $0x860] sm:$0xff]  }
 0x3dd   :  { %5504 = vmatprep.subr.bf16.mxu0 %v6097_v32  ;;  %v6136_v32 = vld [vmem:[%s8292_s5 + $0x8a0] sm:$0xff]  }
 0x3de   :  { %5527 = vmatpush3.bf16.msra.mxu1 %v6096_v40  ;;  %v6139_v40 = vld [vmem:[%s8292_s5 + $0x8e8] sm:$0xff]  }
 0x3df   :  { %5528 = vmatprep.subr.bf16.mxu1 %v6099_v44  ;;  %v6138_v44 = vld [vmem:[%s8292_s5 + $0x820] sm:$0xff]  }
 0x3e0   :  { %5505 = vmatpush3.bf16.msra.mxu0 %v6098_v62  ;;  %v6141_v62 = vld [vmem:[%s8292_s5 + $0x868] sm:$0xff]  }
 0x3e1   :  { %5506 = vmatprep.subr.bf16.mxu0 %v6101_v2  ;;  %v6140_v2 = vld [vmem:[%s8292_s5 + $0x8a8] sm:$0xff]  }
 0x3e2   :  { %5529 = vmatpush3.bf16.msra.mxu1 %v6100_v22  ;;  %v6143_v22 = vld [vmem:[%s8292_s5 + $0x8f0] sm:$0xff]  }
 0x3e3   :  { %5530 = vmatprep.subr.bf16.mxu1 %v6103_v12 }
 0x3e4   :  { %5507 = vmatpush3.bf16.msra.mxu0 %v6102_v7  ;;  %v6142_v7 = vld [vmem:[%s8292_s5 + $0x828] sm:$0xff]  }
 0x3e5   :  { %5508 = vmatprep.subr.bf16.mxu0 %v6105_v37 }
 0x3e6   :  { %5531 = vmatpush3.bf16.msra.mxu1 %v6104_v21  ;;  %v6145_v21 = vld [vmem:[%s8292_s5 + $0x870] sm:$0xff]  }
 0x3e7   :  { %5532 = vmatprep.subr.bf16.mxu1 %v6107_v41 }
 0x3e8   :  { %5509 = vmatpush3.bf16.msra.mxu0 %v6106_v63  ;;  %v5230_v8 = vpop.f32.mrb[20].mxu1 }
 0x3e9   :  { %v5231_v16 = vpop.f32.mrb[21].mxu1  ;;  %5510 = vmatprep.subr.bf16.mxu0 %v6109_v57 }
 0x3ea   :  { %v5232_v3 = vadd.f32 %v5231_v16, %v5230_v8  ;;  %5533 = vmatpush3.bf16.msra.mxu1 %v6108_v24  ;;  %v5208_v45 = vpop.f32.mrb[16].mxu0  ;;  %v5233_v23 = vpop.f32.mrb[22].mxu1  ;;  %v6144_v24 = vld [vmem:[%s8292_s5 + $0x8b0] sm:$0xff]  }
 0x3eb   :  { %v5209_v36 = vpop.f32.mrb[17].mxu0  ;;  %v5234_v60 = vpop.f32.mrb[23].mxu1  ;;  %5534 = vmatprep.subr.bf16.mxu1 %v6111_v52  ;;  %v6149_v23 = vld [vmem:[%s8292_s5 + $0x878] sm:$0xff]  }
 0x3ec   :  { %v5210_v33 = vadd.f32 %v5209_v36, %v5208_v45  ;;  %5511 = vmatpush3.bf16.msra.mxu0 %v6110_v11  ;;  %v5211_v5 = vpop.f32.mrb[18].mxu0  ;;  %v6147_v11 = vld [vmem:[%s8292_s5 + $0x8f8] sm:$0xff]   ;;  %v6151_v36 = vld [vmem:[%s8292_s5 + $0x9c0] sm:$0xff]  }
 0x3ed   :  { %v5212_v4 = vpop.f32.mrb[19].mxu0  ;;  %5512 = vmatprep.subr.bf16.mxu0 %v6113_v6  ;;  %v6150_v60 = vld [vmem:[%s8292_s5 + $0x838] sm:$0xff]   ;;  %v6152_v5 = vld [vmem:[%s8292_s5 + $0x980] sm:$0xff]  }
 0x3ee   :  { %v3866_v35 = vadd.f32 %v5210_v33, %v4861_v53  ;;  %5535 = vmatpush3.bf16.msra.mxu1 %v6112_v14  ;;  %v6148_v53 = vld [vmem:[%s8292_s5 + $0x8b8] sm:$0xff]   ;;  %v6153_v33 = vld [vmem:[%s8292_s5 + $0x940] sm:$0xff]   ;;  %v6155_v4 = vld [vmem:[%s8292_s5 + $0x9c8] sm:$0xff]  }
 0x3ef   :  { %5536 = vmatprep.subr.bf16.mxu1 %v6115_v56 }
 0x3f0   :  { %5513 = vmatpush3.bf16.msra.mxu0 %v6114_v48  ;;  %v8025_v43 = vadd.f32 %v5232_v3, %v3866_v35  ;;  %v6146_v3 = vld [vmem:[%s8292_s5 + $0x830] sm:$0xff]   ;;  %v1258_v48 = vpack.c.bf16 %v7360_v27, %v7360_v27  ;;  %v6154_v35 = vld [vmem:[%s8292_s5 + $0x900] sm:$0xff]   ;;  %v6157_v27 = vld [vmem:[%s8292_s5 + $0x948] sm:$0xff]  }
 0x3f1   :  { %5514 = vmatprep.subr.bf16.mxu0 %v6117_v46  ;;  %v1263_v46 = vpack.c.bf16 %v7381_v10, %v7381_v10  ;;  %v6156_v10 = vld [vmem:[%s8292_s5 + $0x988] sm:$0xff]  }
 0x3f2   :  { %5537 = vmatpush3.bf16.msra.mxu1 %v6116_v0  ;;  %v1256_v0 = vpack.c.bf16 %v7370_v19, %v7370_v19  ;;  %v6159_v19 = vld [vmem:[%s8292_s5 + $0x9d0] sm:$0xff]  }
 0x3f3   :  { %5566 = vmatprep.subr.bf16.mxu1 %v6119_v58  ;;  %v1261_v58 = vpack.c.bf16 %v7390_v25, %v7390_v25  ;;  %v6161_v25 = vld [vmem:[%s8292_s5 + $0x950] sm:$0xff]  }
 0x3f4   :  { %5515 = vmatpush3.bf16.msra.mxu0 %v6118_v47  ;;  %v6158_v47 = vld [vmem:[%s8292_s5 + $0x908] sm:$0xff]  }
 0x3f5   :  { %4464 = vmatmul.mubr.bf16.vlgmr.msra.gmra.mrb[48].mxu1 %v1254_v15  ;;  %5544 = vmatprep.subr.bf16.mxu0 %v6121_v30  ;;  %v6163_v30 = vld [vmem:[%s8292_s5 + $0x9d8] sm:$0xff]  }
 0x3f6   :  { %5567 = vmatpush3.bf16.msra.mxu1 %v6120_v51  ;;  %4543 = vmatprep.mubr.bf16.mxu1 %v1259_v26  ;;  %v6162_v51 = vld [vmem:[%s8292_s5 + $0x910] sm:$0xff]   ;;  %v6165_v15 = vld [vmem:[%s8292_s5 + $0x958] sm:$0xff]   ;;  %v6167_v26 = vld [vmem:[%s8292_s5 + $0x9e0] sm:$0xff]  }
 0x3f7   :  { %4424 = vmatmul.mubr.bf16.vlgmr.msra.gmra.mrb[44].mxu0 %v1252_v20  ;;  %5568 = vmatprep.subr.bf16.mxu1 %v6123_v59  ;;  %v6164_v59 = vld [vmem:[%s8292_s5 + $0x998] sm:$0xff]   ;;  %v6169_v20 = vld [vmem:[%s8292_s5 + $0x960] sm:$0xff]  }
 0x3f8   :  { %5545 = vmatpush3.bf16.msra.mxu0 %v6122_v28  ;;  %4503 = vmatprep.mubr.bf16.mxu0 %v1257_v13  ;;  %v6166_v28 = vld [vmem:[%s8292_s5 + $0x918] sm:$0xff]   ;;  %v6171_v13 = vld [vmem:[%s8292_s5 + $0x9e8] sm:$0xff]  }
 0x3f9   :  { %5546 = vmatprep.subr.bf16.mxu0 %v6125_v61  ;;  %v6168_v61 = vld [vmem:[%s8292_s5 + $0x9a0] sm:$0xff]  }
 0x3fa   :  { %5569 = vmatpush3.bf16.msra.mxu1 %v6124_v38  ;;  %v6170_v38 = vld [vmem:[%s8292_s5 + $0x920] sm:$0xff]  }
 0x3fb   :  { %5570 = vmatprep.subr.bf16.mxu1 %v6127_v55  ;;  %v6173_v55 = vld [vmem:[%s8292_s5 + $0x968] sm:$0xff]  }
 0x3fc   :  { %5547 = vmatpush3.bf16.msra.mxu0 %v6126_v50  ;;  %v6172_v50 = vld [vmem:[%s8292_s5 + $0x9a8] sm:$0xff]  }
 0x3fd   :  { %5548 = vmatprep.subr.bf16.mxu0 %v6129_v54  ;;  %v6175_v54 = vld [vmem:[%s8292_s5 + $0x9f0] sm:$0xff]  }
 0x3fe   :  { %5571 = vmatpush3.bf16.msra.mxu1 %v6128_v34 }
 0x3ff   :  { %5572 = vmatprep.subr.bf16.mxu1 %v6131_v17  ;;  %v6174_v17 = vld [vmem:[%s8292_s5 + $0x928] sm:$0xff]  }
 0x400   :  { %5549 = vmatpush3.bf16.msra.mxu0 %v6130_v1 }
 0x401   :  { %5550 = vmatprep.subr.bf16.mxu0 %v6133_v49  ;;  %v6177_v49 = vld [vmem:[%s8292_s5 + $0x970] sm:$0xff]  }
 0x402   :  { %5573 = vmatpush3.bf16.msra.mxu1 %v6132_v31 }
 0x403   :  { %5574 = vmatprep.subr.bf16.mxu1 %v6135_v42 }
 0x404   :  { %5551 = vmatpush3.bf16.msra.mxu0 %v6134_v29 }
 0x405   :  { %5552 = vmatprep.subr.bf16.mxu0 %v6137_v18  ;;  %v6176_v18 = vld [vmem:[%s8292_s5 + $0x9b0] sm:$0xff]  }
 0x406   :  { %5575 = vmatpush3.bf16.msra.mxu1 %v6136_v32 }
 0x407   :  { %5576 = vmatprep.subr.bf16.mxu1 %v6139_v40 }
 0x408   :  { %v5274_v12 = vpop.f32.mrb[24].mxu1  ;;  %5553 = vmatpush3.bf16.msra.mxu0 %v6138_v44  ;;  %v6179_v44 = vld [vmem:[%s8292_s5 + $0x9f8] sm:$0xff]  }
 0x409   :  { %v5275_v37 = vpop.f32.mrb[25].mxu1  ;;  %5554 = vmatprep.subr.bf16.mxu0 %v6141_v62 }
 0x40a   :  { %v5276_v41 = vadd.f32 %v5275_v37, %v5274_v12  ;;  %v5252_v63 = vpop.f32.mrb[20].mxu0  ;;  %v5277_v57 = vpop.f32.mrb[26].mxu1  ;;  %5577 = vmatpush3.bf16.msra.mxu1 %v6140_v2 }
 0x40b   :  { %v5253_v52 = vpop.f32.mrb[21].mxu0  ;;  %v5278_v8 = vpop.f32.mrb[27].mxu1  ;;  %5578 = vmatprep.subr.bf16.mxu1 %v6143_v22  ;;  %v6178_v22 = vld [vmem:[%s8292_s5 + $0x930] sm:$0xff]   ;;  %v1262_v57 = vpack.c.bf16 %v7375_v39, %v7375_v39 }
 0x40c   :  { %v5254_v16 = vadd.f32 %v5253_v52, %v5252_v63  ;;  %v5255_v6 = vpop.f32.mrb[22].mxu0  ;;  %5555 = vmatpush3.bf16.msra.mxu0 %v6142_v7  ;;  %v6181_v7 = vld [vmem:[%s8292_s5 + $0x978] sm:$0xff]  }
 0x40d   :  { %v5256_v45 = vpop.f32.mrb[23].mxu0  ;;  %5556 = vmatprep.subr.bf16.mxu0 %v6145_v21  ;;  %v6180_v21 = vld [vmem:[%s8292_s5 + $0x9b8] sm:$0xff]  }
 0x40e   :  { %v3946_v14 = vadd.f32 %v5254_v16, %v8025_v43  ;;  %5579 = vmatpush3.bf16.msra.mxu1 %v6144_v24  ;;  %v6160_v43 = vld [vmem:[%s8292_s5 + $0x990] sm:$0xff]   ;;  %v1260_v24 = vpack.c.bf16 %v7384_v9, %v7384_v9 }
 0x40f   :  { %5580 = vmatprep.subr.bf16.mxu1 %v6147_v11 }
 0x410   :  { %5557 = vmatpush3.bf16.msra.mxu0 %v6146_v3  ;;  %v8132_v56 = vadd.f32 %v5276_v41, %v3946_v14  ;;  %v6182_v41 = vld [vmem:[%s8292_s5 + $0x938] sm:$0xff]  }
 0x411   :  { %5558 = vmatprep.subr.bf16.mxu0 %v6149_v23 }
 0x412   :  { %5581 = vmatpush3.bf16.msra.mxu1 %v6148_v53 }
 0x413   :  { %5610 = vmatprep.subr.bf16.mxu1 %v6151_v36 }
 0x414   :  { %5559 = vmatpush3.bf16.msra.mxu0 %v6150_v60 }
 0x415   :  { %4544 = vmatmul.mubr.bf16.vlgmr.msra.gmra.mrb[52].mxu1 %v1258_v48  ;;  %5588 = vmatprep.subr.bf16.mxu0 %v6153_v33 }
 0x416   :  { %5611 = vmatpush3.bf16.msra.mxu1 %v6152_v5  ;;  %4623 = vmatprep.mubr.bf16.mxu1 %v1263_v46 }
 0x417   :  { %4504 = vmatmul.mubr.bf16.vlgmr.msra.gmra.mrb[48].mxu0 %v1256_v0  ;;  %5612 = vmatprep.subr.bf16.mxu1 %v6155_v4 }
 0x418   :  { %5589 = vmatpush3.bf16.msra.mxu0 %v6154_v35  ;;  %4583 = vmatprep.mubr.bf16.mxu0 %v1261_v58  ;;  %v6183_v58 = vld [vmem:[%s8294_s7] sm:$0xff]  }
 0x419   :  { %5590 = vmatprep.subr.bf16.mxu0 %v6157_v27 }
 0x41a   :  { %5613 = vmatpush3.bf16.msra.mxu1 %v6156_v10  ;;  %v6229_v10 = vmov 0.0  }
 0x41b   :  { %5614 = vmatprep.subr.bf16.mxu1 %v6159_v19 }
 0x41c   :  { %5591 = vmatpush3.bf16.msra.mxu0 %v6158_v47 }
 0x41d   :  { %5592 = vmatprep.subr.bf16.mxu0 %v6161_v25 }
 0x41e   :  { %5615 = vmatpush3.bf16.msra.mxu1 %v6160_v43 }
 0x41f   :  { %5616 = vmatprep.subr.bf16.mxu1 %v6163_v30 }
 0x420   :  { %5593 = vmatpush3.bf16.msra.mxu0 %v6162_v51 }
 0x421   :  { %5594 = vmatprep.subr.bf16.mxu0 %v6165_v15 }
 0x422   :  { %5617 = vmatpush3.bf16.msra.mxu1 %v6164_v59 }
 0x423   :  { %5618 = vmatprep.subr.bf16.mxu1 %v6167_v26 }
 0x424   :  { %5595 = vmatpush3.bf16.msra.mxu0 %v6166_v28 }
 0x425   :  { %5596 = vmatprep.subr.bf16.mxu0 %v6169_v20 }
 0x426   :  { %5619 = vmatpush3.bf16.msra.mxu1 %v6168_v61 }
 0x427   :  { %5620 = vmatprep.subr.bf16.mxu1 %v6171_v13 }
 0x428   :  { %v5318_v34 = vpop.f32.mrb[28].mxu1  ;;  %5597 = vmatpush3.bf16.msra.mxu0 %v6170_v38  ;;  %v6184_v38 = vld [vmem:[%s8294_s7 + $0x8] sm:$0xff]  }
 0x429   :  { %v5319_v1 = vpop.f32.mrb[29].mxu1  ;;  %5598 = vmatprep.subr.bf16.mxu0 %v6173_v55  ;;  %v6185_v55 = vld [vmem:[%s8294_s7 + $0x10] sm:$0xff]  }
 0x42a   :  { %v5320_v31 = vadd.f32 %v5319_v1, %v5318_v34  ;;  %v5296_v42 = vpop.f32.mrb[24].mxu0  ;;  %v5321_v29 = vpop.f32.mrb[30].mxu1  ;;  %5621 = vmatpush3.bf16.msra.mxu1 %v6172_v50  ;;  %v6186_v50 = vld [vmem:[%s8294_s7 + $0x18] sm:$0xff]  }
 0x42b   :  { %v5297_v32 = vpop.f32.mrb[25].mxu0  ;;  %v5322_v40 = vpop.f32.mrb[31].mxu1  ;;  %5622 = vmatprep.subr.bf16.mxu1 %v6175_v54 }
 0x42c   :  { %v5298_v62 = vadd.f32 %v5297_v32, %v5296_v42  ;;  %v5299_v2 = vpop.f32.mrb[26].mxu0  ;;  %5599 = vmatpush3.bf16.msra.mxu0 %v6174_v17 }
 0x42d   :  { %v5300_v12 = vpop.f32.mrb[27].mxu0  ;;  %5600 = vmatprep.subr.bf16.mxu0 %v6177_v49 }
 0x42e   :  { %v4026_v37 = vadd.f32 %v5298_v62, %v8132_v56  ;;  %5623 = vmatpush3.bf16.msra.mxu1 %v6176_v18 }
 0x42f   :  { %5624 = vmatprep.subr.bf16.mxu1 %v6179_v44 }
 0x430   :  { %5601 = vmatpush3.bf16.msra.mxu0 %v6178_v22  ;;  %v4066_v63 = vadd.f32 %v5320_v31, %v4026_v37 }
 0x431   :  { %5602 = vmatprep.subr.bf16.mxu0 %v6181_v7 }
 0x432   :  { %5625 = vmatpush3.bf16.msra.mxu1 %v6180_v21 }
 0x433   :  { %5652 = vmatprep.subr.bf16.mxu1 %v6229_v10 }
 0x434   :  { %5603 = vmatpush3.bf16.msra.mxu0 %v6182_v41 }
 0x435   :  { %4624 = vmatmul.mubr.bf16.vlgmr.msra.gmra.mrb[56].mxu1 %v1262_v57  ;;  %5640 = vmatprep.subr.bf16.mxu0 %v6229_v10 }
 0x436   :  { %5656 = vmatprep.mubr.msk.bf16.mxu1 %vm6230_vm14, %v6229_v10 }
 0x437   :  { %4584 = vmatmul.mubr.bf16.vlgmr.msra.gmra.mrb[52].mxu0 %v1260_v24 }
 0x438   :  { %5641 = vmatpush3.bf16.msra.mxu0 %v6183_v58  ;;  %5648 = vmatprep.mubr.msk.bf16.mxu0 %vm6230_vm14, %v6229_v10 }
 0x439   :  { %5642 = vmatprep.subr.bf16.mxu0 %v6229_v10 }
 0x43c   :  { %5643 = vmatpush3.bf16.msra.mxu0 %v6184_v38  ;;  %v5188_v38 = vld [vmem:[%s8297_s10] ss:$0 sm:$0xff] }
 0x43d   :  { %5644 = vmatprep.subr.bf16.mxu0 %v6229_v10 }
 0x440   :  { %5645 = vmatpush3.bf16.msra.mxu0 %v6185_v55 }
 0x441   :  { %5646 = vmatprep.subr.bf16.mxu0 %v6229_v10 }
 0x444   :  { %5647 = vmatpush3.bf16.msra.mxu0 %v6186_v50 }
 0x448   :  { %v5362_v52 = vpop.f32.mrb[32].mxu1 }
 0x449   :  { %v5363_v8 = vpop.f32.mrb[33].mxu1 }
 0x44a   :  { %v5364_v11 = vadd.f32 %v5363_v8, %v5362_v52  ;;  %v5340_v16 = vpop.f32.mrb[28].mxu0  ;;  %v5365_v6 = vpop.f32.mrb[34].mxu1 }
 0x44b   :  { %v5341_v3 = vpop.f32.mrb[29].mxu0  ;;  %v5366_v45 = vpop.f32.mrb[35].mxu1 }
 0x44c   :  { %v5342_v23 = vadd.f32 %v5341_v3, %v5340_v16  ;;  %v5343_v14 = vpop.f32.mrb[30].mxu0 }
 0x44d   :  { %v5344_v53 = vpop.f32.mrb[31].mxu0 }
 0x44e   :  { %v4106_v36 = vadd.f32 %v5342_v23, %v4066_v63 }
 0x450   :  { %v4146_v60 = vadd.f32 %v5364_v11, %v4106_v36 }
 0x468   :  { %v5406_v56 = vpop.f32.mrb[36].mxu1 }
 0x469   :  { %v5407_v39 = vpop.f32.mrb[37].mxu1 }
 0x46a   :  { %v5408_v33 = vadd.f32 %v5407_v39, %v5406_v56  ;;  %v5384_v5 = vpop.f32.mrb[32].mxu0  ;;  %v5409_v48 = vpop.f32.mrb[38].mxu1 }
 0x46b   :  { %v5385_v4 = vpop.f32.mrb[33].mxu0  ;;  %v5410_v9 = vpop.f32.mrb[39].mxu1 }
 0x46c   :  { %v5386_v46 = vadd.f32 %v5385_v4, %v5384_v5  ;;  %v5387_v35 = vpop.f32.mrb[34].mxu0 }
 0x46d   :  { %v5388_v0 = vpop.f32.mrb[35].mxu0 }
 0x46e   :  { %v4186_v27 = vadd.f32 %v5386_v46, %v4146_v60 }
 0x470   :  { %v4226_v19 = vadd.f32 %v5408_v33, %v4186_v27 }
 0x488   :  { %v5450_v47 = vpop.f32.mrb[40].mxu1 }
 0x489   :  { %v5451_v25 = vpop.f32.mrb[41].mxu1 }
 0x48a   :  { %v5452_v43 = vadd.f32 %v5451_v25, %v5450_v47  ;;  %v5428_v30 = vpop.f32.mrb[36].mxu0  ;;  %v5453_v51 = vpop.f32.mrb[42].mxu1 }
 0x48b   :  { %v5429_v15 = vpop.f32.mrb[37].mxu0  ;;  %v5454_v59 = vpop.f32.mrb[43].mxu1  ;;  %v5182_v51 = vld [vmem:[%s8295_s8] ss:$0 sm:$0xff]  ;;  %s6231_s8 = smov [#allocation2]  }
 0x48c   :  { %v5430_v26 = vadd.f32 %v5429_v15, %v5428_v30  ;;  %v5431_v28 = vpop.f32.mrb[38].mxu0  ;;  %v6188_v30 = vld [vmem:[%s8296_s9 + $0x8] sm:$0xff]  }
 0x48d   :  { %v5432_v20 = vpop.f32.mrb[39].mxu0 }
 0x48e   :  { %v4266_v61 = vadd.f32 %v5430_v26, %v4226_v19 }
 0x490   :  { %v4306_v13 = vadd.f32 %v5452_v43, %v4266_v61  ;;  %v6187_v43 = vld [vmem:[%s8296_s9] sm:$0xff]   ;;  %s4804_s9 = sshll.u32 %s6231_s8, 4  ;;  %s4805_s9 = int_to_ptr.vmem [resolvable:$true] %s4804_s9 }
 0x491   :  { %5653 = vmatpush3.bf16.msra.mxu1 %v6187_v43  ;;  %s6196_s10 = scalar_lea.vmem %s4805_s9, 32  ;;  %p6201_p1 = scmp.lt.s32.totalorder %s4805_s9, %s4805_s9 }
 0x492   :  { %5654 = vmatprep.subr.bf16.mxu1 %v6229_v10  ;;  %p6197_p0 = scmp.ne.s32.totalorder %s4805_s9, %s6196_s10  ;;  %p6202_p2 = scmp.lt.s32.totalorder %s6196_s10, %s6196_s10 }
 0x494   :  { %p6203_p3 = por %p6202_p2, %p6201_p1 }
 0x495   :  { %5655 = vmatpush3.bf16.msra.mxu1 %v6188_v30 }
 0x496   :  { %p6204_p4 = pnand %p6203_p3, %p6197_p0 }
 0x4a8   :  { %v5494_v54 = vpop.f32.mrb[44].mxu1 }
 0x4a9   :  { %v5495_v34 = vpop.f32.mrb[45].mxu1 }
 0x4aa   :  { %v5496_v17 = vadd.f32 %v5495_v34, %v5494_v54  ;;  %v5472_v1 = vpop.f32.mrb[40].mxu0  ;;  %v5497_v49 = vpop.f32.mrb[46].mxu1 }
 0x4ab   :  { %v5473_v31 = vpop.f32.mrb[41].mxu0  ;;  %v5498_v42 = vpop.f32.mrb[47].mxu1 }
 0x4ac   :  { %v5474_v29 = vadd.f32 %v5473_v31, %v5472_v1  ;;  %v5475_v18 = vpop.f32.mrb[42].mxu0 }
 0x4ad   :  { %v5476_v32 = vpop.f32.mrb[43].mxu0 }
 0x4ae   :  { %v4346_v40 = vadd.f32 %v5474_v29, %v4306_v13 }
 0x4b0   :  { %v4386_v44 = vadd.f32 %v5496_v17, %v4346_v40 }
 0x4c8   :  { %v5538_v62 = vpop.f32.mrb[48].mxu1 }
 0x4c9   :  { %v5539_v2 = vpop.f32.mrb[49].mxu1 }
 0x4ca   :  { %v5540_v22 = vadd.f32 %v5539_v2, %v5538_v62  ;;  %v5516_v12 = vpop.f32.mrb[44].mxu0  ;;  %v5541_v7 = vpop.f32.mrb[50].mxu1 }
 0x4cb   :  { %v5517_v37 = vpop.f32.mrb[45].mxu0  ;;  %v5542_v21 = vpop.f32.mrb[51].mxu1 }
 0x4cc   :  { %v5518_v41 = vadd.f32 %v5517_v37, %v5516_v12  ;;  %v5519_v63 = vpop.f32.mrb[46].mxu0 }
 0x4cd   :  { %v5520_v57 = vpop.f32.mrb[47].mxu0 }
 0x4ce   :  { %v4426_v24 = vadd.f32 %v5518_v41, %v4386_v44 }
 0x4d0   :  { %v4466_v52 = vadd.f32 %v5540_v22, %v4426_v24 }
 0x4e8   :  { %v5582_v8 = vpop.f32.mrb[52].mxu1 }
 0x4e9   :  { %v5583_v11 = vpop.f32.mrb[53].mxu1 }
 0x4ea   :  { %v5584_v16 = vadd.f32 %v5583_v11, %v5582_v8  ;;  %v5560_v6 = vpop.f32.mrb[48].mxu0  ;;  %v5585_v3 = vpop.f32.mrb[54].mxu1 }
 0x4eb   :  { %v5561_v45 = vpop.f32.mrb[49].mxu0  ;;  %v5586_v23 = vpop.f32.mrb[55].mxu1 }
 0x4ec   :  { %v5562_v14 = vadd.f32 %v5561_v45, %v5560_v6  ;;  %v5563_v53 = vpop.f32.mrb[50].mxu0 }
 0x4ed   :  { %v5564_v36 = vpop.f32.mrb[51].mxu0 }
 0x4ee   :  { %v4506_v60 = vadd.f32 %v5562_v14, %v4466_v52 }
 0x4f0   :  { %v4546_v56 = vadd.f32 %v5584_v16, %v4506_v60 }
 0x508   :  { %v5626_v39 = vpop.f32.mrb[56].mxu1 }
 0x509   :  { %v5627_v33 = vpop.f32.mrb[57].mxu1 }
 0x50a   :  { %v5628_v5 = vadd.f32 %v5627_v33, %v5626_v39  ;;  %v5604_v48 = vpop.f32.mrb[52].mxu0  ;;  %v5629_v4 = vpop.f32.mrb[58].mxu1 }
 0x50b   :  { %v5605_v9 = vpop.f32.mrb[53].mxu0  ;;  %v5630_v46 = vpop.f32.mrb[59].mxu1 }
 0x50c   :  { %v5606_v35 = vadd.f32 %v5605_v9, %v5604_v48  ;;  %v5607_v0 = vpop.f32.mrb[54].mxu0 }
 0x50d   :  { %v5608_v27 = vpop.f32.mrb[55].mxu0 }
 0x50e   :  { %v4586_v58 = vadd.f32 %v5606_v35, %v4546_v56 }
 0x510   :  { %v4626_v19 = vadd.f32 %v5628_v5, %v4586_v58 }
 0x512   :  { %v4631_v47 = vmax.f32 %v4626_v19, 0.0 }
 0x514   :  { %v4632_v25 = vpack.c.bf16 %v4631_v47, %v4631_v47 }
 0x516   :  { %5649 = vmatmul.mubr.msk.bf16.vlgmr.msra.gmra.mrb[56].mxu0 %vm4672_vm15, %v4632_v25 }
 0x5e9   :  { %v4710_v15 = vpop.f32.mrb[56].mxu0 }
 0x5ea   :  { %v4711_v59 = vadd.f32 %v5182_v51, %v4710_v15  ;;  %v5650_v26 = vpop.f32.mrb[57].mxu0 }
 0x5eb   :  { %v4713_v28 = vpop.f32.mrb[58].mxu0 }
 0x5ec   :  { %v4716_v20 = vmax.f32 %v4711_v59, 0.0  ;;  %v5651_v61 = vpop.f32.mrb[59].mxu0 }
 0x5ee   :  { %v4717_v13 = vpack.c.bf16 %v4716_v20, %v4716_v20 }
 0x5f0   :  { %5657 = vmatmul.mubr.msk.bf16.vlgmr.msra.gmra.mrb[60].mxu1 %vm4741_vm0, %v4717_v13 }
 0x6c3   :  { %v4779_v55 = vpop.f32.mrb[60].mxu1 }
 0x6c4   :  { %v4780_v10 = vadd.f32 %v5188_v38, %v4779_v55  ;;  %v5658_v50 = vpop.f32.mrb[61].mxu1 }
 0x6c5   :  { %v4782_v54 = vpop.f32.mrb[62].mxu1 }
 0x6c6   :  { %v5659_v34 = vpop.f32.mrb[63].mxu1  ;;  %v4786_v17 = vsel %vm4785_vm1, %v4780_v10, -inf }
 0x6c7   :  { %4787 = vmax.xlane.f32.xlu0 %v4786_v17 }
 0x754   :  { %v4788_v1 = vpop.xlane.xlu0 %4787 }
 0x755   :  { %v4789_v49 = vsub.f32 %v4780_v10, %v4788_v1 }
 0x757   :  { %v4790_v31 = vmul.f32 1.442695, %v4789_v49 }
 0x759   :  { %6189 = vpow2.f32 %v4790_v31 }
 0x763   :  { %v6190_v42 = vpop.eup %6189 }
 0x764   :  { %v4792_v29 = vsel %vm4785_vm1, %v6190_v42, 0.0 }
 0x765   :  { %4793 = vadd.xlane.f32.xlu1 %v4792_v29 }
 0x7f2   :  { %v4794_v18 = vpop.xlane.xlu1 %4793 }
 0x7f3   :  { %6191 = vrcp.f32 %v4794_v18 }
 0x7fd   :  { %v6192_v32 = vpop.eup %6191 }
 0x7fe   :  { %v4796_v40 = vmul.f32 %v6192_v32, %v6190_v42 }
 0x800   :  { %4797 = vst.msk [vmem:[#allocation2] sm:$0x3] %vm4785_vm1, %v4796_v40 }
 0x801   :  { %6207 = shalt.err (!%p6204_p4)
}
 0x802   :  { %s6208_s14 = scalar_lea.hbm %s8298_s11, 32 }
 0x803   :  { %p6209_p5 = scmp.ne.s32.totalorder %s8298_s11, %s6208_s14  ;;  %p6212_p6 = scmp.lt.u32.totalorder %s6208_s14, %s8298_s11 }
 0x805   :  { %p6214_p7 = pnand %p6212_p6, %p6209_p5 }
 0x807   :  { %6217 = shalt.err (!%p6214_p7)
}
 0x808   :  { %4807 = dma.vmem_to_hbm [thread:$0]  %s4805_s9, 32, %s8298_s11, [#allocation3]  }
 0x809   :  { %6218 = dma.done.wait [#allocation3], 32  }
 0x80a   :  { %6219 = vsyncadd [#allocation3], 4294967264 }
 0x80b   :  { %4811 = vsyncpa [#allocation3], 1 }

</bundles_post_ra>
